<compile_context>
chip_gen: v6e
topology: v6e:2x2x1
jax: 0.10.0
libtpu: 0.0.40
codegen_flags: <defaults>
</compile_context>

<pallas_src>
import functools

import jax
import jax.numpy as jnp
from jax.experimental import pallas as pl
from jax.experimental.pallas import tpu as pltpu


def _round_up(v, m):
    return ((v + m - 1) // m) * m


# ----------------------------- Pallas kernel --------------------------------
def _joint_cat_pose_kernel(x_ref,      # (BT, C, R_pad)     bf16, channel-major
                           wconv_ref,  # (N0, k*k*C)        f32, fused conv taps
                           bconv_ref,  # (N0, 1)            f32
                           wfc_ref,    # (N0, num_classes)  f32, 1/(H*W) folded in
                           bfc_ref,    # (1, num_classes)   f32
                           out_ref,    # (BT, num_classes)  f32
                           rhs_ref,    # (k*k*C, chunk)     f32 VMEM scratch
                           *, k, wp, w_img, nq, chunk, n_chunks, bt):
    kk = k * k
    c = x_ref.shape[1]
    n0 = wconv_ref.shape[0]

    # Hoist the tiny constant loads out of all loops (resident in vregs).
    w_stack = wconv_ref[...]                      # (N0, kk*C)
    b_conv = bconv_ref[...]                       # (N0, 1)
    w_fc = wfc_ref[...]                           # (N0, NC)
    b_fc = bfc_ref[...]                           # (1, NC)

    inv_wp = 1.0 / float(wp)

    for bi in range(bt):                          # images in this grid step
        pooled = jnp.zeros((n0, 1), jnp.float32)
        for ci in range(n_chunks):                # lane chunks (static starts)
            q0 = ci * chunk
            # Assemble the fused-K RHS: rows [t*C, t*C+C) hold the C channels
            # of tap t = kh*k + kw, lane-shifted by kh*Wp + kw.  All slice
            # starts are static -> aligned tile addressing + static rotates.
            for t in range(kk):
                shift = (t // k) * wp + (t % k)
                rhs_ref[pl.ds(t * c, c), :] = (
                    x_ref[bi, :, pl.ds(q0 + shift, chunk)].astype(jnp.float32))
            # One MXU push per chunk: (N0, kkC) @ (kkC, chunk), f32 accumulate.
            acc = jnp.dot(w_stack, rhs_ref[...],
                          preferred_element_type=jnp.float32)
            feat = jnp.maximum(acc + b_conv, 0.0)          # bias + ReLU
            # In-kernel valid mask (replaces the old HBM mask operand):
            #   q = q0 + lane; valid iff q < Nq and (q mod Wp) < W.
            # Exact f32 arithmetic (q + 0.5 is never a multiple of Wp and all
            # integers involved are << 2^23), so no vector int div/mod needed.
            col = jax.lax.broadcasted_iota(jnp.int32, (1, chunk), 1)
            col = col.astype(jnp.float32) + float(q0)
            rowi = jnp.floor((col + 0.5) * inv_wp)
            jcol = col - rowi * float(wp)                   # exact q mod Wp
            mask = jnp.where((col < float(nq)) & (jcol < float(w_img)),
                             1.0, 0.0).astype(jnp.float32)
            # Global-average-pool partial sum: lane-axis (XLU) reduction.
            pooled = pooled + jnp.sum(feat * mask, axis=1, keepdims=True)
        # fc: contraction over N0 as broadcast-multiply + sublane reduction;
        # the 1/(H*W) GAP scale is already folded into w_fc on the host.
        logits = jnp.sum(w_fc * pooled, axis=0, keepdims=True) + b_fc
        out_ref[pl.ds(bi, 1), :] = logits.astype(out_ref.dtype)


# ------------------------------ Host wrapper ---------------------------------
@functools.partial(jax.jit, static_argnames=("k", "images_per_step", "chunk"))
def joint_cat_pose_forward(x, w_conv, b_conv, w_fc, b_fc, *,
                           k=3, images_per_step=1, chunk=512):
    """x: (B, C, H, W) NCHW float32. Returns (B, num_classes) float32."""
    B, C, H, W = x.shape
    N0 = w_conv.shape[0]
    NC = w_fc.shape[0]
    if k % 2 != 1:
        raise ValueError("synthetic backbone assumes odd (SAME-padded) kernel")
    pad = k // 2
    Hp, Wp = H + 2 * pad, W + 2 * pad
    R = Hp * Wp                          # flattened padded spatial positions
    Nq = (H - 1) * Wp + W                # last valid flattened output row + 1
    KKC = k * k * C

    # Lane-chunk size: multiple of 128, big enough to amortize MXU fill on
    # v6e/v7x, small enough that the (N0, chunk) f32 accumulator stays in
    # vregs (<= 16 vregs at chunk=512; keeps v5e's single vst slot free).
    CHUNK = min(_round_up(chunk, 128), _round_up(Nq, 128))
    n_chunks = -(-Nq // CHUNK)
    max_shift = (k - 1) * Wp + (k - 1)
    # Pad the lane axis so every shifted chunk read stays in bounds and the
    # per-image block is 128-lane dense.
    R_pad = _round_up(max(R, n_chunks * CHUNK + max_shift), 128)

    # Images per grid step (amortizes per-step overhead at small H, W).
    BT = max(1, min(images_per_step, B))
    while B % BT:
        BT -= 1

    # Channel-major, zero-padded, flattened: (B, C, R_pad); bf16 so the image
    # DMA is half-width.  The spatial axis is the (dense) lane axis.
    xp = jnp.pad(x, ((0, 0), (0, 0), (pad, pad), (pad, pad)))     # (B,C,Hp,Wp)
    x_flat = xp.reshape(B, C, R)
    x_flat = jnp.pad(x_flat, ((0, 0), (0, 0), (0, R_pad - R)))
    x_flat = x_flat.astype(jnp.bfloat16)

    # Fused conv taps: (N0, k*k*C); row order (kh, kw, c) matches the kernel's
    # RHS assembly (t = kh*k + kw -> rows t*C .. t*C+C).
    w_stack = jnp.transpose(w_conv, (0, 2, 3, 1)).reshape(N0, KKC)
    w_stack = w_stack.astype(jnp.float32)
    b_conv2 = b_conv.reshape(N0, 1).astype(jnp.float32)
    # fc weight transposed to (N0, NC) with the 1/(H*W) GAP scale folded in.
    w_fc2 = (jnp.transpose(w_fc) * (1.0 / float(H * W))).astype(jnp.float32)
    b_fc2 = b_fc.reshape(1, NC).astype(jnp.float32)

    kernel = functools.partial(_joint_cat_pose_kernel, k=k, wp=Wp, w_img=W,
                               nq=Nq, chunk=CHUNK, n_chunks=n_chunks, bt=BT)

    out = pl.pallas_call(
        kernel,
        out_shape=jax.ShapeDtypeStruct((B // BT, BT, NC), jnp.float32),
        grid=(B // BT,),                                     # batch tiles
        in_specs=[
            pl.BlockSpec((BT, C, R_pad), lambda g: (g, 0, 0)),   # images
            pl.BlockSpec((N0, KKC), lambda g: (0, 0)),           # fused taps
            pl.BlockSpec((N0, 1), lambda g: (0, 0)),             # conv bias
            pl.BlockSpec((N0, NC), lambda g: (0, 0)),            # fc weight
            pl.BlockSpec((1, NC), lambda g: (0, 0)),             # fc bias
        ],
        out_specs=pl.BlockSpec((None, BT, NC), lambda g: (g, 0, 0)),
        scratch_shapes=[pltpu.VMEM((KKC, CHUNK), jnp.float32)],
        compiler_params=pltpu.CompilerParams(
            dimension_semantics=("parallel",),   # v7x: batch tiles across TCs
            vmem_limit_bytes=32 * 1024 * 1024),  # headroom under v7x 64 MiB
    )(x_flat, w_stack, b_conv2, w_fc2, b_fc2)
    return out.reshape(B, NC)


# ----------------------------------- main ------------------------------------
if __name__ == "__main__":
    # Small shapes consistent with the module's forward:
    B, C, H, W = 4, 4, 16, 16          # NCHW image input
    K = 3                              # synthetic backbone conv kernel
    N0 = 32                            # feature dim fed into self.fc
    NUM_CLASSES = 12                   # num_classes = len(classes); pick 12

    key = jax.random.PRNGKey(0)
    kx, kwc, kbc, kwf, kbf = jax.random.split(key, 5)

    x = jax.random.normal(kx, (B, C, H, W), dtype=jnp.float32)
    # Deterministic synthetic parameters (shapes per nn.Conv2d / nn.Linear):
    w_conv = 0.1 * jax.random.normal(kwc, (N0, C, K, K), dtype=jnp.float32)
    b_conv = 0.1 * jax.random.normal(kbc, (N0,), dtype=jnp.float32)
    w_fc = 0.1 * jax.random.normal(kwf, (NUM_CLASSES, N0), dtype=jnp.float32)
    b_fc = 0.1 * jax.random.normal(kbf, (NUM_CLASSES,), dtype=jnp.float32)

    y = joint_cat_pose_forward(x, w_conv, b_conv, w_fc, b_fc,
                               k=K, images_per_step=2)
    y = jax.block_until_ready(y)

    # Pure-JAX f32 reference for a quick sanity check.
    def ref(x):
        f = jax.lax.conv_general_dilated(
            x, w_conv, (1, 1), "SAME",
            dimension_numbers=("NCHW", "OIHW", "NCHW"))
        f = jnp.maximum(f + b_conv[None, :, None, None], 0.0)
        feat = f.mean(axis=(2, 3))                 # global average pool (B, N0)
        return feat @ w_fc.T + b_fc[None, :]

    y_ref = ref(x)
    assert y.shape == (B, NUM_CLASSES)
    # Image is bf16 on the MXU path (weights + accumulation stay f32).
    assert jnp.allclose(y, y_ref, atol=2e-2, rtol=2e-2), (y, y_ref)

    print("KERNEL_OK")
</pallas_src>

<mosaic_0001>
module attributes {stable_mosaic.version = 11 : i64} {
  func.func @_joint_cat_pose_kernel(%arg0: i32, %arg1: memref<2x4x512xbf16, #tpu.memory_space<vmem>>, %arg2: memref<32x36xf32, #tpu.memory_space<vmem>>, %arg3: memref<32x1xf32, #tpu.memory_space<vmem>>, %arg4: memref<32x12xf32, #tpu.memory_space<vmem>>, %arg5: memref<1x12xf32, #tpu.memory_space<vmem>>, %arg6: memref<1x2x12xf32, #tpu.memory_space<vmem>>, %arg7: memref<36x384xf32, #tpu.memory_space<vmem>>) attributes {dimension_semantics = [#tpu.dimension_semantics<parallel>], iteration_bounds = array<i64: 2>, scalar_prefetch = 0 : i64, scratch_operands = 1 : i64, tpu.core_type = #tpu.core_type<tc>, window_params = [{transform_indices = @transform_0, window_bounds = array<i64: 2, 4, 512>}, {pipeline_mode = #tpu.pipeline_mode<synchronous>, transform_indices = @transform_1, window_bounds = array<i64: 32, 36>}, {pipeline_mode = #tpu.pipeline_mode<synchronous>, transform_indices = @transform_2, window_bounds = array<i64: 32, 1>}, {pipeline_mode = #tpu.pipeline_mode<synchronous>, transform_indices = @transform_3, window_bounds = array<i64: 32, 12>}, {pipeline_mode = #tpu.pipeline_mode<synchronous>, transform_indices = @transform_4, window_bounds = array<i64: 1, 12>}, {transform_indices = @transform_5, window_bounds = array<i64: 1, 2, 12>}]} {
    %c0 = arith.constant 0 : index
    %c0_0 = arith.constant 0 : index
    %0 = vector.load %arg2[%c0, %c0_0] : memref<32x36xf32, #tpu.memory_space<vmem>>, vector<32x36xf32>
    %c0_1 = arith.constant 0 : index
    %c0_2 = arith.constant 0 : index
    %1 = vector.load %arg3[%c0_1, %c0_2] : memref<32x1xf32, #tpu.memory_space<vmem>>, vector<32x1xf32>
    %c0_3 = arith.constant 0 : index
    %c0_4 = arith.constant 0 : index
    %2 = vector.load %arg4[%c0_3, %c0_4] : memref<32x12xf32, #tpu.memory_space<vmem>>, vector<32x12xf32>
    %c0_5 = arith.constant 0 : index
    %c0_6 = arith.constant 0 : index
    %3 = vector.load %arg5[%c0_5, %c0_6] : memref<1x12xf32, #tpu.memory_space<vmem>>, vector<1x12xf32>
    %cst = arith.constant 0.000000e+00 : f32
    %4 = vector.broadcast %cst : f32 to vector<32x1xf32>
    %c0_7 = arith.constant 0 : index
    %c0_8 = arith.constant 0 : index
    %c0_9 = arith.constant 0 : index
    %5 = vector.load %arg1[%c0_7, %c0_8, %c0_9] : memref<2x4x512xbf16, #tpu.memory_space<vmem>>, vector<1x4x384xbf16>
    %6 = vector.shape_cast %5 : vector<1x4x384xbf16> to vector<4x384xbf16>
    %7 = arith.extf %6 : vector<4x384xbf16> to vector<4x384xf32>
    %c0_10 = arith.constant 0 : index
    %c0_11 = arith.constant 0 : index
    %8 = vector.load %arg7[%c0_10, %c0_11] : memref<36x384xf32, #tpu.memory_space<vmem>>, vector<4x384xf32>
    tpu.vector_store %arg7[%c0_10, %c0_11], %7 {strides = array<i32>} : memref<36x384xf32, #tpu.memory_space<vmem>>, vector<4x384xf32>,
    %c0_12 = arith.constant 0 : index
    %c0_13 = arith.constant 0 : index
    %c1 = arith.constant 1 : index
    %9 = vector.load %arg1[%c0_12, %c0_13, %c1] : memref<2x4x512xbf16, #tpu.memory_space<vmem>>, vector<1x4x384xbf16>
    %10 = vector.shape_cast %9 : vector<1x4x384xbf16> to vector<4x384xbf16>
    %11 = arith.extf %10 : vector<4x384xbf16> to vector<4x384xf32>
    %c4 = arith.constant 4 : index
    %c0_14 = arith.constant 0 : index
    %12 = vector.load %arg7[%c4, %c0_14] : memref<36x384xf32, #tpu.memory_space<vmem>>, vector<4x384xf32>
    tpu.vector_store %arg7[%c4, %c0_14], %11 {strides = array<i32>} : memref<36x384xf32, #tpu.memory_space<vmem>>, vector<4x384xf32>,
    %c0_15 = arith.constant 0 : index
    %c0_16 = arith.constant 0 : index
    %c2 = arith.constant 2 : index
    %13 = vector.load %arg1[%c0_15, %c0_16, %c2] : memref<2x4x512xbf16, #tpu.memory_space<vmem>>, vector<1x4x384xbf16>
    %14 = vector.shape_cast %13 : vector<1x4x384xbf16> to vector<4x384xbf16>
    %15 = arith.extf %14 : vector<4x384xbf16> to vector<4x384xf32>
    %c8 = arith.constant 8 : index
    %c0_17 = arith.constant 0 : index
    %16 = vector.load %arg7[%c8, %c0_17] : memref<36x384xf32, #tpu.memory_space<vmem>>, vector<4x384xf32>
    tpu.vector_store %arg7[%c8, %c0_17], %15 {strides = array<i32>} : memref<36x384xf32, #tpu.memory_space<vmem>>, vector<4x384xf32>,
    %c0_18 = arith.constant 0 : index
    %c0_19 = arith.constant 0 : index
    %c18 = arith.constant 18 : index
    %17 = vector.load %arg1[%c0_18, %c0_19, %c18] : memref<2x4x512xbf16, #tpu.memory_space<vmem>>, vector<1x4x384xbf16>
    %18 = vector.shape_cast %17 : vector<1x4x384xbf16> to vector<4x384xbf16>
    %19 = arith.extf %18 : vector<4x384xbf16> to vector<4x384xf32>
    %c12 = arith.constant 12 : index
    %c0_20 = arith.constant 0 : index
    %20 = vector.load %arg7[%c12, %c0_20] : memref<36x384xf32, #tpu.memory_space<vmem>>, vector<4x384xf32>
    tpu.vector_store %arg7[%c12, %c0_20], %19 {strides = array<i32>} : memref<36x384xf32, #tpu.memory_space<vmem>>, vector<4x384xf32>,
    %c0_21 = arith.constant 0 : index
    %c0_22 = arith.constant 0 : index
    %c19 = arith.constant 19 : index
    %21 = vector.load %arg1[%c0_21, %c0_22, %c19] : memref<2x4x512xbf16, #tpu.memory_space<vmem>>, vector<1x4x384xbf16>
    %22 = vector.shape_cast %21 : vector<1x4x384xbf16> to vector<4x384xbf16>
    %23 = arith.extf %22 : vector<4x384xbf16> to vector<4x384xf32>
    %c16 = arith.constant 16 : index
    %c0_23 = arith.constant 0 : index
    %24 = vector.load %arg7[%c16, %c0_23] : memref<36x384xf32, #tpu.memory_space<vmem>>, vector<4x384xf32>
    tpu.vector_store %arg7[%c16, %c0_23], %23 {strides = array<i32>} : memref<36x384xf32, #tpu.memory_space<vmem>>, vector<4x384xf32>,
    %c0_24 = arith.constant 0 : index
    %c0_25 = arith.constant 0 : index
    %c20 = arith.constant 20 : index
    %25 = vector.load %arg1[%c0_24, %c0_25, %c20] : memref<2x4x512xbf16, #tpu.memory_space<vmem>>, vector<1x4x384xbf16>
    %26 = vector.shape_cast %25 : vector<1x4x384xbf16> to vector<4x384xbf16>
    %27 = arith.extf %26 : vector<4x384xbf16> to vector<4x384xf32>
    %c20_26 = arith.constant 20 : index
    %c0_27 = arith.constant 0 : index
    %28 = vector.load %arg7[%c20_26, %c0_27] : memref<36x384xf32, #tpu.memory_space<vmem>>, vector<4x384xf32>
    tpu.vector_store %arg7[%c20_26, %c0_27], %27 {strides = array<i32>} : memref<36x384xf32, #tpu.memory_space<vmem>>, vector<4x384xf32>,
    %c0_28 = arith.constant 0 : index
    %c0_29 = arith.constant 0 : index
    %c36 = arith.constant 36 : index
    %29 = vector.load %arg1[%c0_28, %c0_29, %c36] : memref<2x4x512xbf16, #tpu.memory_space<vmem>>, vector<1x4x384xbf16>
    %30 = vector.shape_cast %29 : vector<1x4x384xbf16> to vector<4x384xbf16>
    %31 = arith.extf %30 : vector<4x384xbf16> to vector<4x384xf32>
    %c24 = arith.constant 24 : index
    %c0_30 = arith.constant 0 : index
    %32 = vector.load %arg7[%c24, %c0_30] : memref<36x384xf32, #tpu.memory_space<vmem>>, vector<4x384xf32>
    tpu.vector_store %arg7[%c24, %c0_30], %31 {strides = array<i32>} : memref<36x384xf32, #tpu.memory_space<vmem>>, vector<4x384xf32>,
    %c0_31 = arith.constant 0 : index
    %c0_32 = arith.constant 0 : index
    %c37 = arith.constant 37 : index
    %33 = vector.load %arg1[%c0_31, %c0_32, %c37] : memref<2x4x512xbf16, #tpu.memory_space<vmem>>, vector<1x4x384xbf16>
    %34 = vector.shape_cast %33 : vector<1x4x384xbf16> to vector<4x384xbf16>
    %35 = arith.extf %34 : vector<4x384xbf16> to vector<4x384xf32>
    %c28 = arith.constant 28 : index
    %c0_33 = arith.constant 0 : index
    %36 = vector.load %arg7[%c28, %c0_33] : memref<36x384xf32, #tpu.memory_space<vmem>>, vector<4x384xf32>
    tpu.vector_store %arg7[%c28, %c0_33], %35 {strides = array<i32>} : memref<36x384xf32, #tpu.memory_space<vmem>>, vector<4x384xf32>,
    %c0_34 = arith.constant 0 : index
    %c0_35 = arith.constant 0 : index
    %c38 = arith.constant 38 : index
    %37 = vector.load %arg1[%c0_34, %c0_35, %c38] : memref<2x4x512xbf16, #tpu.memory_space<vmem>>, vector<1x4x384xbf16>
    %38 = vector.shape_cast %37 : vector<1x4x384xbf16> to vector<4x384xbf16>
    %39 = arith.extf %38 : vector<4x384xbf16> to vector<4x384xf32>
    %c32 = arith.constant 32 : index
    %c0_36 = arith.constant 0 : index
    %40 = vector.load %arg7[%c32, %c0_36] : memref<36x384xf32, #tpu.memory_space<vmem>>, vector<4x384xf32>
    tpu.vector_store %arg7[%c32, %c0_36], %39 {strides = array<i32>} : memref<36x384xf32, #tpu.memory_space<vmem>>, vector<4x384xf32>,
    %c0_37 = arith.constant 0 : index
    %c0_38 = arith.constant 0 : index
    %41 = vector.load %arg7[%c0_37, %c0_38] : memref<36x384xf32, #tpu.memory_space<vmem>>, vector<36x384xf32>
    %cst_39 = arith.constant dense<0.000000e+00> : vector<32x384xf32>
    %42 = tpu.matmul %0, %41, %cst_39 {dimension_numbers = #tpu.dot_dimension_numbers<[1], [0], [0], [1], [0, 0, 1, 1], [], []>} : vector<32x36xf32>, vector<36x384xf32>, vector<32x384xf32> -> vector<32x384xf32>
    %43 = vector.broadcast %1 : vector<32x1xf32> to vector<32x384xf32>
    %44 = arith.addf %42, %43 : vector<32x384xf32>
    %cst_40 = arith.constant 0.000000e+00 : f32
    %45 = vector.broadcast %cst_40 : f32 to vector<32x384xf32>
    %46 = arith.maximumf %44, %45 : vector<32x384xf32>
    %47 = tpu.iota {dimensions = array<i32: 1>} : vector<1x384xi32>
    %48 = arith.sitofp %47 : vector<1x384xi32> to vector<1x384xf32>
    %cst_41 = arith.constant 0.000000e+00 : f32
    %49 = vector.broadcast %cst_41 : f32 to vector<1x384xf32>
    %50 = arith.addf %48, %49 : vector<1x384xf32>
    %cst_42 = arith.constant 5.000000e-01 : f32
    %51 = vector.broadcast %cst_42 : f32 to vector<1x384xf32>
    %52 = arith.addf %50, %51 : vector<1x384xf32>
    %cst_43 = arith.constant 0.055555556 : f32
    %53 = vector.broadcast %cst_43 : f32 to vector<1x384xf32>
    %54 = arith.mulf %52, %53 : vector<1x384xf32>
    %55 = math.floor %54 : vector<1x384xf32>
    %cst_44 = arith.constant 1.800000e+01 : f32
    %56 = vector.broadcast %cst_44 : f32 to vector<1x384xf32>
    %57 = arith.mulf %55, %56 : vector<1x384xf32>
    %58 = arith.subf %50, %57 : vector<1x384xf32>
    %cst_45 = arith.constant 2.860000e+02 : f32
    %59 = vector.broadcast %cst_45 : f32 to vector<1x384xf32>
    %60 = arith.cmpf olt, %50, %59 : vector<1x384xf32>
    %cst_46 = arith.constant 1.600000e+01 : f32
    %61 = vector.broadcast %cst_46 : f32 to vector<1x384xf32>
    %62 = arith.cmpf olt, %58, %61 : vector<1x384xf32>
    %63 = arith.andi %60, %62 : vector<1x384xi1>
    %cst_47 = arith.constant 1.000000e+00 : f32
    %cst_48 = arith.constant 0.000000e+00 : f32
    %64 = vector.broadcast %cst_47 : f32 to vector<1x384xf32>
    %65 = vector.broadcast %cst_48 : f32 to vector<1x384xf32>
    %66 = arith.select %63, %64, %65 : vector<1x384xi1>, vector<1x384xf32>
    %67 = vector.broadcast %66 : vector<1x384xf32> to vector<32x384xf32>
    %68 = arith.mulf %46, %67 : vector<32x384xf32>
    %cst_49 = arith.constant dense<0.000000e+00> : vector<32xf32>
    %69 = vector.multi_reduction <add>, %68, %cst_49 [1] : vector<32x384xf32> to vector<32xf32>
    %70 = vector.shape_cast %69 : vector<32xf32> to vector<32x1xf32>
    %71 = arith.addf %4, %70 : vector<32x1xf32>
    %72 = vector.broadcast %71 : vector<32x1xf32> to vector<32x12xf32>
    %73 = arith.mulf %2, %72 : vector<32x12xf32>
    %cst_50 = arith.constant dense<0.000000e+00> : vector<12xf32>
    %74 = vector.multi_reduction <add>, %73, %cst_50 [0] : vector<32x12xf32> to vector<12xf32>
    %75 = vector.shape_cast %74 : vector<12xf32> to vector<1x12xf32>
    %76 = arith.addf %75, %3 : vector<1x12xf32>
    %c0_51 = arith.constant 0 : index
    %c0_52 = arith.constant 0 : index
    %c0_53 = arith.constant 0 : index
    %77 = vector.load %arg6[%c0_51, %c0_52, %c0_53] : memref<1x2x12xf32, #tpu.memory_space<vmem>>, vector<1x1x12xf32>
    %78 = vector.shape_cast %77 : vector<1x1x12xf32> to vector<1x12xf32>
    %79 = vector.shape_cast %76 : vector<1x12xf32> to vector<1x1x12xf32>
    tpu.vector_store %arg6[%c0_51, %c0_52, %c0_53], %79 {strides = array<i32>} : memref<1x2x12xf32, #tpu.memory_space<vmem>>, vector<1x1x12xf32>,
    %cst_54 = arith.constant 0.000000e+00 : f32
    %80 = vector.broadcast %cst_54 : f32 to vector<32x1xf32>
    %c1_55 = arith.constant 1 : index
    %c0_56 = arith.constant 0 : index
    %c0_57 = arith.constant 0 : index
    %81 = vector.load %arg1[%c1_55, %c0_56, %c0_57] : memref<2x4x512xbf16, #tpu.memory_space<vmem>>, vector<1x4x384xbf16>
    %82 = vector.shape_cast %81 : vector<1x4x384xbf16> to vector<4x384xbf16>
    %83 = arith.extf %82 : vector<4x384xbf16> to vector<4x384xf32>
    %c0_58 = arith.constant 0 : index
    %c0_59 = arith.constant 0 : index
    %84 = vector.load %arg7[%c0_58, %c0_59] : memref<36x384xf32, #tpu.memory_space<vmem>>, vector<4x384xf32>
    tpu.vector_store %arg7[%c0_58, %c0_59], %83 {strides = array<i32>} : memref<36x384xf32, #tpu.memory_space<vmem>>, vector<4x384xf32>,
    %c1_60 = arith.constant 1 : index
    %c0_61 = arith.constant 0 : index
    %c1_62 = arith.constant 1 : index
    %85 = vector.load %arg1[%c1_60, %c0_61, %c1_62] : memref<2x4x512xbf16, #tpu.memory_space<vmem>>, vector<1x4x384xbf16>
    %86 = vector.shape_cast %85 : vector<1x4x384xbf16> to vector<4x384xbf16>
    %87 = arith.extf %86 : vector<4x384xbf16> to vector<4x384xf32>
    %c4_63 = arith.constant 4 : index
    %c0_64 = arith.constant 0 : index
    %88 = vector.load %arg7[%c4_63, %c0_64] : memref<36x384xf32, #tpu.memory_space<vmem>>, vector<4x384xf32>
    tpu.vector_store %arg7[%c4_63, %c0_64], %87 {strides = array<i32>} : memref<36x384xf32, #tpu.memory_space<vmem>>, vector<4x384xf32>,
    %c1_65 = arith.constant 1 : index
    %c0_66 = arith.constant 0 : index
    %c2_67 = arith.constant 2 : index
    %89 = vector.load %arg1[%c1_65, %c0_66, %c2_67] : memref<2x4x512xbf16, #tpu.memory_space<vmem>>, vector<1x4x384xbf16>
    %90 = vector.shape_cast %89 : vector<1x4x384xbf16> to vector<4x384xbf16>
    %91 = arith.extf %90 : vector<4x384xbf16> to vector<4x384xf32>
    %c8_68 = arith.constant 8 : index
    %c0_69 = arith.constant 0 : index
    %92 = vector.load %arg7[%c8_68, %c0_69] : memref<36x384xf32, #tpu.memory_space<vmem>>, vector<4x384xf32>
    tpu.vector_store %arg7[%c8_68, %c0_69], %91 {strides = array<i32>} : memref<36x384xf32, #tpu.memory_space<vmem>>, vector<4x384xf32>,
    %c1_70 = arith.constant 1 : index
    %c0_71 = arith.constant 0 : index
    %c18_72 = arith.constant 18 : index
    %93 = vector.load %arg1[%c1_70, %c0_71, %c18_72] : memref<2x4x512xbf16, #tpu.memory_space<vmem>>, vector<1x4x384xbf16>
    %94 = vector.shape_cast %93 : vector<1x4x384xbf16> to vector<4x384xbf16>
    %95 = arith.extf %94 : vector<4x384xbf16> to vector<4x384xf32>
    %c12_73 = arith.constant 12 : index
    %c0_74 = arith.constant 0 : index
    %96 = vector.load %arg7[%c12_73, %c0_74] : memref<36x384xf32, #tpu.memory_space<vmem>>, vector<4x384xf32>
    tpu.vector_store %arg7[%c12_73, %c0_74], %95 {strides = array<i32>} : memref<36x384xf32, #tpu.memory_space<vmem>>, vector<4x384xf32>,
    %c1_75 = arith.constant 1 : index
    %c0_76 = arith.constant 0 : index
    %c19_77 = arith.constant 19 : index
    %97 = vector.load %arg1[%c1_75, %c0_76, %c19_77] : memref<2x4x512xbf16, #tpu.memory_space<vmem>>, vector<1x4x384xbf16>
    %98 = vector.shape_cast %97 : vector<1x4x384xbf16> to vector<4x384xbf16>
    %99 = arith.extf %98 : vector<4x384xbf16> to vector<4x384xf32>
    %c16_78 = arith.constant 16 : index
    %c0_79 = arith.constant 0 : index
    %100 = vector.load %arg7[%c16_78, %c0_79] : memref<36x384xf32, #tpu.memory_space<vmem>>, vector<4x384xf32>
    tpu.vector_store %arg7[%c16_78, %c0_79], %99 {strides = array<i32>} : memref<36x384xf32, #tpu.memory_space<vmem>>, vector<4x384xf32>,
    %c1_80 = arith.constant 1 : index
    %c0_81 = arith.constant 0 : index
    %c20_82 = arith.constant 20 : index
    %101 = vector.load %arg1[%c1_80, %c0_81, %c20_82] : memref<2x4x512xbf16, #tpu.memory_space<vmem>>, vector<1x4x384xbf16>
    %102 = vector.shape_cast %101 : vector<1x4x384xbf16> to vector<4x384xbf16>
    %103 = arith.extf %102 : vector<4x384xbf16> to vector<4x384xf32>
    %c20_83 = arith.constant 20 : index
    %c0_84 = arith.constant 0 : index
    %104 = vector.load %arg7[%c20_83, %c0_84] : memref<36x384xf32, #tpu.memory_space<vmem>>, vector<4x384xf32>
    tpu.vector_store %arg7[%c20_83, %c0_84], %103 {strides = array<i32>} : memref<36x384xf32, #tpu.memory_space<vmem>>, vector<4x384xf32>,
    %c1_85 = arith.constant 1 : index
    %c0_86 = arith.constant 0 : index
    %c36_87 = arith.constant 36 : index
    %105 = vector.load %arg1[%c1_85, %c0_86, %c36_87] : memref<2x4x512xbf16, #tpu.memory_space<vmem>>, vector<1x4x384xbf16>
    %106 = vector.shape_cast %105 : vector<1x4x384xbf16> to vector<4x384xbf16>
    %107 = arith.extf %106 : vector<4x384xbf16> to vector<4x384xf32>
    %c24_88 = arith.constant 24 : index
    %c0_89 = arith.constant 0 : index
    %108 = vector.load %arg7[%c24_88, %c0_89] : memref<36x384xf32, #tpu.memory_space<vmem>>, vector<4x384xf32>
    tpu.vector_store %arg7[%c24_88, %c0_89], %107 {strides = array<i32>} : memref<36x384xf32, #tpu.memory_space<vmem>>, vector<4x384xf32>,
    %c1_90 = arith.constant 1 : index
    %c0_91 = arith.constant 0 : index
    %c37_92 = arith.constant 37 : index
    %109 = vector.load %arg1[%c1_90, %c0_91, %c37_92] : memref<2x4x512xbf16, #tpu.memory_space<vmem>>, vector<1x4x384xbf16>
    %110 = vector.shape_cast %109 : vector<1x4x384xbf16> to vector<4x384xbf16>
    %111 = arith.extf %110 : vector<4x384xbf16> to vector<4x384xf32>
    %c28_93 = arith.constant 28 : index
    %c0_94 = arith.constant 0 : index
    %112 = vector.load %arg7[%c28_93, %c0_94] : memref<36x384xf32, #tpu.memory_space<vmem>>, vector<4x384xf32>
    tpu.vector_store %arg7[%c28_93, %c0_94], %111 {strides = array<i32>} : memref<36x384xf32, #tpu.memory_space<vmem>>, vector<4x384xf32>,
    %c1_95 = arith.constant 1 : index
    %c0_96 = arith.constant 0 : index
    %c38_97 = arith.constant 38 : index
    %113 = vector.load %arg1[%c1_95, %c0_96, %c38_97] : memref<2x4x512xbf16, #tpu.memory_space<vmem>>, vector<1x4x384xbf16>
    %114 = vector.shape_cast %113 : vector<1x4x384xbf16> to vector<4x384xbf16>
    %115 = arith.extf %114 : vector<4x384xbf16> to vector<4x384xf32>
    %c32_98 = arith.constant 32 : index
    %c0_99 = arith.constant 0 : index
    %116 = vector.load %arg7[%c32_98, %c0_99] : memref<36x384xf32, #tpu.memory_space<vmem>>, vector<4x384xf32>
    tpu.vector_store %arg7[%c32_98, %c0_99], %115 {strides = array<i32>} : memref<36x384xf32, #tpu.memory_space<vmem>>, vector<4x384xf32>,
    %c0_100 = arith.constant 0 : index
    %c0_101 = arith.constant 0 : index
    %117 = vector.load %arg7[%c0_100, %c0_101] : memref<36x384xf32, #tpu.memory_space<vmem>>, vector<36x384xf32>
    %cst_102 = arith.constant dense<0.000000e+00> : vector<32x384xf32>
    %118 = tpu.matmul %0, %117, %cst_102 {dimension_numbers = #tpu.dot_dimension_numbers<[1], [0], [0], [1], [0, 0, 1, 1], [], []>} : vector<32x36xf32>, vector<36x384xf32>, vector<32x384xf32> -> vector<32x384xf32>
    %119 = vector.broadcast %1 : vector<32x1xf32> to vector<32x384xf32>
    %120 = arith.addf %118, %119 : vector<32x384xf32>
    %cst_103 = arith.constant 0.000000e+00 : f32
    %121 = vector.broadcast %cst_103 : f32 to vector<32x384xf32>
    %122 = arith.maximumf %120, %121 : vector<32x384xf32>
    %123 = tpu.iota {dimensions = array<i32: 1>} : vector<1x384xi32>
    %124 = arith.sitofp %123 : vector<1x384xi32> to vector<1x384xf32>
    %cst_104 = arith.constant 0.000000e+00 : f32
    %125 = vector.broadcast %cst_104 : f32 to vector<1x384xf32>
    %126 = arith.addf %124, %125 : vector<1x384xf32>
    %cst_105 = arith.constant 5.000000e-01 : f32
    %127 = vector.broadcast %cst_105 : f32 to vector<1x384xf32>
    %128 = arith.addf %126, %127 : vector<1x384xf32>
    %cst_106 = arith.constant 0.055555556 : f32
    %129 = vector.broadcast %cst_106 : f32 to vector<1x384xf32>
    %130 = arith.mulf %128, %129 : vector<1x384xf32>
    %131 = math.floor %130 : vector<1x384xf32>
    %cst_107 = arith.constant 1.800000e+01 : f32
    %132 = vector.broadcast %cst_107 : f32 to vector<1x384xf32>
    %133 = arith.mulf %131, %132 : vector<1x384xf32>
    %134 = arith.subf %126, %133 : vector<1x384xf32>
    %cst_108 = arith.constant 2.860000e+02 : f32
    %135 = vector.broadcast %cst_108 : f32 to vector<1x384xf32>
    %136 = arith.cmpf olt, %126, %135 : vector<1x384xf32>
    %cst_109 = arith.constant 1.600000e+01 : f32
    %137 = vector.broadcast %cst_109 : f32 to vector<1x384xf32>
    %138 = arith.cmpf olt, %134, %137 : vector<1x384xf32>
    %139 = arith.andi %136, %138 : vector<1x384xi1>
    %cst_110 = arith.constant 1.000000e+00 : f32
    %cst_111 = arith.constant 0.000000e+00 : f32
    %140 = vector.broadcast %cst_110 : f32 to vector<1x384xf32>
    %141 = vector.broadcast %cst_111 : f32 to vector<1x384xf32>
    %142 = arith.select %139, %140, %141 : vector<1x384xi1>, vector<1x384xf32>
    %143 = vector.broadcast %142 : vector<1x384xf32> to vector<32x384xf32>
    %144 = arith.mulf %122, %143 : vector<32x384xf32>
    %cst_112 = arith.constant dense<0.000000e+00> : vector<32xf32>
    %145 = vector.multi_reduction <add>, %144, %cst_112 [1] : vector<32x384xf32> to vector<32xf32>
    %146 = vector.shape_cast %145 : vector<32xf32> to vector<32x1xf32>
    %147 = arith.addf %80, %146 : vector<32x1xf32>
    %148 = vector.broadcast %147 : vector<32x1xf32> to vector<32x12xf32>
    %149 = arith.mulf %2, %148 : vector<32x12xf32>
    %cst_113 = arith.constant dense<0.000000e+00> : vector<12xf32>
    %150 = vector.multi_reduction <add>, %149, %cst_113 [0] : vector<32x12xf32> to vector<12xf32>
    %151 = vector.shape_cast %150 : vector<12xf32> to vector<1x12xf32>
    %152 = arith.addf %151, %3 : vector<1x12xf32>
    %c0_114 = arith.constant 0 : index
    %c1_115 = arith.constant 1 : index
    %c0_116 = arith.constant 0 : index
    %153 = vector.load %arg6[%c0_114, %c1_115, %c0_116] : memref<1x2x12xf32, #tpu.memory_space<vmem>>, vector<1x1x12xf32>
    %154 = vector.shape_cast %153 : vector<1x1x12xf32> to vector<1x12xf32>
    %155 = vector.shape_cast %152 : vector<1x12xf32> to vector<1x1x12xf32>
    tpu.vector_store %arg6[%c0_114, %c1_115, %c0_116], %155 {strides = array<i32>} : memref<1x2x12xf32, #tpu.memory_space<vmem>>, vector<1x1x12xf32>,
    return
  }
  func.func @transform_0(%arg0: i32) -> (i32, i32, i32) {
    %c0_i32 = arith.constant 0 : i32
    %c0_i32_0 = arith.constant 0 : i32
    %c0_i32_1 = arith.constant 0 : i32
    return %arg0, %c0_i32, %c0_i32_0 : i32, i32, i32
  }
  func.func @transform_1(%arg0: i32) -> (i32, i32) {
    %c0_i32 = arith.constant 0 : i32
    %c0_i32_0 = arith.constant 0 : i32
    %c0_i32_1 = arith.constant 0 : i32
    return %c0_i32, %c0_i32_0 : i32, i32
  }
  func.func @transform_2(%arg0: i32) -> (i32, i32) {
    %c0_i32 = arith.constant 0 : i32
    %c0_i32_0 = arith.constant 0 : i32
    %c0_i32_1 = arith.constant 0 : i32
    return %c0_i32, %c0_i32_0 : i32, i32
  }
  func.func @transform_3(%arg0: i32) -> (i32, i32) {
    %c0_i32 = arith.constant 0 : i32
    %c0_i32_0 = arith.constant 0 : i32
    %c0_i32_1 = arith.constant 0 : i32
    return %c0_i32, %c0_i32_0 : i32, i32
  }
  func.func @transform_4(%arg0: i32) -> (i32, i32) {
    %c0_i32 = arith.constant 0 : i32
    %c0_i32_0 = arith.constant 0 : i32
    %c0_i32_1 = arith.constant 0 : i32
    return %c0_i32, %c0_i32_0 : i32, i32
  }
  func.func @transform_5(%arg0: i32) -> (i32, i32, i32) {
    %c0_i32 = arith.constant 0 : i32
    %c0_i32_0 = arith.constant 0 : i32
    %c0_i32_1 = arith.constant 0 : i32
    return %arg0, %c0_i32, %c0_i32_0 : i32, i32, i32
  }
}

</mosaic_0001>

<bundles_post_ra>
// kernel: joint_cat_pose_forward.1
= control target key start
LH: loop header
LB: loop body
LE: loop exit
PB: predicated region body
PF: predicated region fallthrough
CT: control target
= control target key end

     0   :  { %10 = vsyncpa [#allocation4], 0  ;;  %s2059_s0 = inlined_call_operand.vmem [shape: bf16[4,4,512], index: 0, kind: input, shape index: {}]   ;;  %s2060_s1 = inlined_call_operand.vmem [shape: f32[32,36], index: 1, kind: input, shape index: {}]   ;;  %s2061_s2 = inlined_call_operand.vmem [shape: f32[32,1], index: 2, kind: input, shape index: {}]   ;;  %s2062_s3 = inlined_call_operand.vmem [shape: f32[32,12], index: 3, kind: input, shape index: {}]   ;;  %s2063_s4 = inlined_call_operand.vmem [shape: f32[1,12], index: 4, kind: input, shape index: {}]   ;;  %s2064_s5 = inlined_call_operand.hbm [shape: f32[2,2,12], index: 5, kind: output, shape index: {}]  }
   0x1   :  { %12 = vsyncpa [#allocation4 + $0x1], 0  ;;  %s1698_s18 = smov 0   ;;  %s1700_s19 = smov 0  }
   0x2   :  { %s1702_s20 = smov 0   ;;  %s1704_s21 = smov 0  }
   0x3 LB: > { %s1719_s22 = sadd.s32 4294967295, %s1655_s21   ;;  %s1320_s23 = sadd.s32 4294967294, %s1655_s21   ;;  %s1655_s21 = sphi %s1704_s21, %s2070_s21   ;;  %s1651_s20 = sphi %s1702_s20, %s2069_s20   ;;  %s1647_s19 = sphi %s1700_s19, %s2068_s19   ;;  %s1643_s18 = sphi %s1698_s18, %s2067_s18  }
   0x4   : > { %s1723_s24 = sadd.s32 1, %s1655_s21   ;;  %s135_s25 = sadd.s32 1, %s1651_s20 }
   0x5   : > { %s132_s26 = ssub.s32 %s1655_s21, %s1723_s24  ;;  %p145_p0 = scmp.ne.s32.totalorder %s1651_s20, %s1647_s19 }
   0x6   : > { %p133_p1 = scmp.eq.s32.totalorder %s132_s26, 0  ;;  %p146_p2 = scmp.eq.s32.totalorder %s1719_s22, 1 }
   0x7   : > { %p151_p3 = scmp.ne.s32.totalorder %s1647_s19, %s1643_s18  ;;  %p152_p4 = scmp.eq.s32.totalorder %s1320_s23, 1 }
   0x8   : > { %s1734_s27 = scalar_select %p133_p1, %s1651_s20, %s135_s25  }
   0x9   : > { %p1736_p5 = por %p146_p2, %p145_p0  ;;  %p1740_p6 = por %p152_p4, %p151_p3 }
   0xa   : > { %p1323_p7 = scmp.ge.s32.totalorder %s1655_s21, 1  ;;  %p192_p8 = scmp.lt.s32.totalorder %s1655_s21, 3 }
   0xc   : > { %p193_p9 = pnand %p1323_p7, %p192_p8 }
   0xd   : > { %s1325_s30 = sshll.u32 (!%p193_p9), %s1719_s22, 1  ;;  %s1657_s10 = smov (!%p193_p9), 90  }
   0xe   : > { %196 = sbr.rel (%p193_p9) target bundleno = 610 (0x262), region = 40  ;;  %p222_p10 = scmp.lt.s32.totalorder (!%p193_p9), %s1325_s30, 3 }
   0xf   : > { %s1658_s11 = smov (!%p193_p9), 91   ;;  %s1659_s12 = smov (!%p193_p9), 92  }
  0x10   : > { %s1660_s13 = smov (!%p193_p9), 108   ;;  %s1661_s14 = smov (!%p193_p9), 109  }
  0x11   : > { %s1662_s15 = smov (!%p193_p9), 110   ;;  %s1663_s16 = smov (!%p193_p9), 126  }
  0x12   : > { %s1664_s17 = smov (!%p193_p9), 127  }
  0x13   : > { %s2072_s30 = smov (!%p222_p10, %s1325_s30), 3  ;;  %v1774_v23 = vld [vmem:[%s2060_s1] sm:$0xff]  ;;  %vm485_vm0 = vcmask 293888   ;;  %v1665_v24 = vmov 0.0   ;;  %v233_v27 = vld [vmem:[%s2061_s2 + $0x8] sm:$0xff]  ;;  %v1666_v29 = vmov 0  }
  0x14   : > { %s1363_s6 = sshll.u32 %s2072_s30, 3  ;;  %572 = vmatprep.mubr.f32.mxu0 %v1665_v24  ;;  %1392 = vmatprep.mubr.msk.f32.mxu1 %vm485_vm0, %v1774_v23  ;;  %v232_v28 = vld [vmem:[%s2061_s2] sm:$0xff]  ;;  %v234_v30 = vld [vmem:[%s2061_s2 + $0x10] sm:$0xff]  ;;  %v235_v31 = vld [vmem:[%s2061_s2 + $0x18] sm:$0xff]  ;;  %vm440_vm1 = vcmask 736256   ;;  %vm415_vm2 = vcmask 744448  }
  0x15   : > { %s1750_s9 = scalar_lea.vmem %s2059_s0, %s1363_s6  ;;  %1594 = vset.pattern.permute.xlu1 %v1666_v29  ;;  %1593 = vset.pattern.permute.xlu0 %v1666_v29  ;;  %vm390_vm3 = vcmask 752640   ;;  %vm365_vm4 = vcmask 883712   ;;  %vm340_vm5 = vcmask 891904   ;;  %vm498_vm6 = vcmask 1043456   ;;  %s1667_s6 = smov [#allocation3]  }
  0x16   : > { %v425_v0 = vld [vmem:[%s1750_s9] sm:$0xff]  ;;  %v1347_v14 = vld [vmem:[%s1750_s9 + $0x8] sm:$0xff]  ;;  %vm315_vm7 = vcmask 900096   ;;  %vm290_vm8 = vcmask 1031168   ;;  %vm265_vm9 = vcmask 1039360   ;;  %s1599_s7 = sshll.u32 %s1667_s6, 4  ;;  %s1600_s7 = int_to_ptr.vmem [resolvable:$false] %s1599_s7 }
  0x17   : > { %v427_v1 = vunpack.c.h.bf16 %v425_v0  ;;  %v426_v2 = vunpack.c.l.bf16 %v425_v0  ;;  %v241_v11 = vld [vmem:[%s1750_s9] sm:$0x3f]  ;;  %v963_v16 = vunpack.c.l.bf16 %v1347_v14  ;;  %v964_v17 = vunpack.c.h.bf16 %v1347_v14 }
  0x18   : > { %v243_v12 = vunpack.c.h.bf16 %v241_v11  ;;  %v242_v13 = vunpack.c.l.bf16 %v241_v11 }
  0x19   : > { %v431_v3 = vcombine.high %v427_v1, %v427_v1  ;;  %v406_v4 = vcombine.low %v427_v1, %v427_v1  ;;  %v430_v5 = vcombine.high %v426_v2, %v426_v2  ;;  %v405_v9 = vcombine.low %v426_v2, %v426_v2 }
  0x1a   : > { %249 = vst [vmem:[#allocation2 + $0x58] sm:$0xf] %v243_v12  ;;  %v245_v15 = vcombine.high %v242_v13, %v242_v13  ;;  %247 = vst [vmem:[#allocation2 + $0x30] sm:$0xf] %v242_v13  ;;  %v967_v18 = vcombine.high %v963_v16, %v963_v16  ;;  %v968_v19 = vcombine.high %v964_v17, %v964_v17 }
  0x1b   : > { %v1463_v6 = vpack.i.bf16 %v431_v3, %v427_v1  ;;  %v1473_v7 = vpack.i.bf16 %v427_v1, %v406_v4  ;;  %v1478_v8 = vpack.i.bf16 %v426_v2, %v430_v5  ;;  %v1498_v10 = vpack.i.bf16 %v405_v9, %v426_v2 }
  0x1c   : > { %248 = vst [vmem:[#allocation2] sm:$0xf] %v245_v15  ;;  %v1543_v20 = vpack.i.bf16 %v964_v17, %v967_v18  ;;  %v1548_v21 = vpack.i.bf16 %v968_v19, %v963_v16  ;;  %v944_v22 = vcombine.low %v964_v17, %v964_v17  ;;  %v943_v26 = vcombine.low %v963_v16, %v963_v16 }
  0x1d   : > { %1464 = vrot.lane.b32.xlu0 %v1463_v6, %s1657_s10  ;;  %1474 = vrot.lane.b32.xlu1 %v1473_v7, %s1658_s11 }
  0x1e   : > { %v1558_v25 = vpack.i.bf16 %v944_v22, %v963_v16 }
  0x21   : > { %1479 = vrot.lane.b32.xlu1 %v1478_v8, %s1657_s10  ;;  %1469 = vrot.lane.b32.xlu0 %v1463_v6, %s1659_s12 }
  0x25   : > { %1489 = vrot.lane.b32.xlu1 %v1473_v7, %s1660_s13  ;;  %1484 = vrot.lane.b32.xlu0 %v1463_v6, %s1661_s14 }
  0x29   : > { %1499 = vrot.lane.b32.xlu1 %v1498_v10, %s1658_s11  ;;  %1494 = vrot.lane.b32.xlu0 %v1478_v8, %s1659_s12 }
  0x2d   : > { %1509 = vrot.lane.b32.xlu1 %v1473_v7, %s1662_s15  ;;  %1504 = vrot.lane.b32.xlu0 %v1463_v6, %s1663_s16 }
  0x31   : > { %1519 = vrot.lane.b32.xlu1 %v1498_v10, %s1660_s13  ;;  %1514 = vrot.lane.b32.xlu0 %v1478_v8, %s1661_s14 }
  0x35   : > { %1529 = vrot.lane.b32.xlu1 %v1478_v8, %s1663_s16  ;;  %1524 = vrot.lane.b32.xlu0 %v1473_v7, %s1664_s17 }
  0x39   : > { %1534 = vrot.lane.b32.xlu0 %v1498_v10, %s1662_s15  ;;  %1539 = vrot.lane.b32.xlu1 %v1498_v10, %s1664_s17 }
  0x3d   : > { %1544 = vrot.lane.b32.xlu0 %v1543_v20, %s1657_s10  ;;  %1549 = vrot.lane.b32.xlu1 %v1548_v21, %s1657_s10 }
  0x41   : > { %1554 = vrot.lane.b32.xlu0 %v1543_v20, %s1659_s12  ;;  %1559 = vrot.lane.b32.xlu1 %v1558_v25, %s1658_s11 }
  0x45   : > { %1564 = vrot.lane.b32.xlu0 %v1548_v21, %s1659_s12  ;;  %945 = vrot.lane.b32.xlu1 %v943_v26, %s1658_s11 }
  0x49   : > { %1569 = vrot.lane.b32.xlu0 %v1543_v20, %s1661_s14  ;;  %1574 = vrot.lane.b32.xlu1 %v1558_v25, %s1660_s13 }
  0x4d   : > { %873 = vrot.lane.b32.xlu0 %v963_v16, %s1661_s14  ;;  %897 = vrot.lane.b32.xlu1 %v943_v26, %s1660_s13 }
  0x51   : > { %1579 = vrot.lane.b32.xlu0 %v1543_v20, %s1663_s16  ;;  %1584 = vrot.lane.b32.xlu1 %v1558_v25, %s1662_s15 }
  0x55   : > { %825 = vrot.lane.b32.xlu0 %v963_v16, %s1663_s16  ;;  %849 = vrot.lane.b32.xlu1 %v943_v26, %s1662_s15 }
  0x59   : > { %1589 = vrot.lane.b32.xlu0 %v1558_v25, %s1664_s17  ;;  %801 = vrot.lane.b32.xlu1 %v943_v26, %s1664_s17 }
  0x5d   : > { %951 = vrot.lane.b32.xlu0 %v964_v17, %s1658_s11  ;;  %879 = vrot.lane.b32.xlu1 %v968_v19, %s1661_s14  ;;  %s218_s11 = sand.u32 1, %s1647_s19   ;;  %s1360_s14 = sshll.u32 %s1719_s22, 5 }
  0x5e   : > { %s1324_s12 = sshll.u32 %s218_s11, 1  ;;  %s1259_s25 = scalar_lea.hbm %s2064_s5, %s1360_s14 }
  0x5f   : > { %s1248_s26 = scalar_lea.sflag [#allocation4], %s218_s11  ;;  %s1601_s22 = scalar_lea.vmem %s1600_s7, 64 }
  0x61   : > { %903 = vrot.lane.b32.xlu0 %v964_v17, %s1660_s13  ;;  %831 = vrot.lane.b32.xlu1 %v968_v19, %s1663_s16 }
  0x65   : > { %855 = vrot.lane.b32.xlu0 %v964_v17, %s1662_s15  ;;  %807 = vrot.lane.b32.xlu1 %v964_v17, %s1664_s17  ;;  %s220_s15 = scalar_lea.vmem [#allocation3], %s1324_s12 }
  0x66   : > { %s1261_s16 = sshll.u32 %s220_s15, 4  ;;  %s1262_s16 = int_to_ptr.vmem [resolvable:$true] %s1261_s16 }
  0x67   : > { %s1595_s30 = scalar_lea.vmem %s1262_s16, 32  ;;  %p1602_p0 = scmp.lt.s32.totalorder %s1262_s16, %s1600_s7 }
  0x68   : > { %p1596_p11 = scmp.ne.s32.totalorder %s1262_s16, %s1595_s30  ;;  %p1603_p1 = scmp.lt.s32.totalorder %s1601_s22, %s1595_s30 }
  0x69   : > { %472 = vperm.xlu1 %1594, %v233_v27   ;;  %467 = vperm.xlu0 %1593, %v232_v28  }
  0x6a   : > { %p1597_p12 = pnand %p1596_p11, %p1736_p5  ;;  %p1604_p2 = por %p1603_p1, %p1602_p0 }
  0x6c   : > { %p1598_p13 = pneg %p1597_p12 }
  0x6d   : > { %477 = vperm.xlu1 %1594, %v234_v30   ;;  %482 = vperm.xlu0 %1593, %v235_v31  }
  0x6e   : > { %p1605_p3 = pnand %p1604_p2, %p1598_p13 }
  0x8f   : > { %v1465_v32 = vpop.permute.xlu0 %1464  ;;  %v1475_v33 = vpop.permute.xlu1 %1474 }
  0x90   : > { %v1467_v34 = vunpack.i.h.bf16 %v1465_v32  ;;  %v1466_v35 = vunpack.i.l.bf16 %v1465_v32  ;;  %v1477_v36 = vunpack.i.h.bf16 %v1475_v33  ;;  %v1476_v37 = vunpack.i.l.bf16 %v1475_v33 }
  0x92   : > { %v443_v38 = vsel %vm440_vm1, %v1466_v35, %v1467_v34  ;;  %v418_v39 = vsel %vm415_vm2, %v1476_v37, %v1477_v36 }
  0x93   : > { %449 = vst [vmem:[#allocation2 + $0x28] sm:$0xf] %v443_v38  ;;  %424 = vst [vmem:[#allocation2 + $0x38] sm:$0xf0] %v418_v39  ;;  %v1480_v40 = vpop.permute.xlu1 %1479  ;;  %v1470_v41 = vpop.permute.xlu0 %1469 }
  0x94   : > { %v1482_v42 = vunpack.i.h.bf16 %v1480_v40  ;;  %v1481_v43 = vunpack.i.l.bf16 %v1480_v40  ;;  %v1472_v44 = vunpack.i.h.bf16 %v1470_v41  ;;  %v1471_v45 = vunpack.i.l.bf16 %v1470_v41 }
  0x96   : > { %v441_v46 = vsel %vm440_vm1, %v1482_v42, %v1481_v43  ;;  %v442_v47 = vsel %vm440_vm1, %v1481_v43, %v1466_v35  ;;  %v393_v48 = vsel %vm390_vm3, %v1471_v45, %v1472_v44 }
  0x97   : > { %447 = vst [vmem:[#allocation2 + $0x60] sm:$0xf] %v441_v46  ;;  %448 = vst [vmem:[#allocation2 + $0x70] sm:$0xf] %v442_v47  ;;  %v1490_v49 = vpop.permute.xlu1 %1489  ;;  %v1485_v50 = vpop.permute.xlu0 %1484  ;;  %v1339_v46 = vld [vmem:[%s1750_s9 + $0x8] sm:$0x3f] }
  0x98   : > { %399 = vst [vmem:[#allocation2 + $0x38] sm:$0xf] %v393_v48  ;;  %v1492_v51 = vunpack.i.h.bf16 %v1490_v49  ;;  %v1491_v52 = vunpack.i.l.bf16 %v1490_v49  ;;  %v1487_v53 = vunpack.i.h.bf16 %v1485_v50  ;;  %v1486_v54 = vunpack.i.l.bf16 %v1485_v50 }
  0x9a   : > { %v368_v55 = vsel %vm365_vm4, %v1491_v52, %v1492_v51  ;;  %v343_v56 = vsel %vm340_vm5, %v1486_v54, %v1487_v53  ;;  %v464_v57 = vld [vmem:[#allocation2 + $0x28] sm:$0xf] }
  0x9b   : > { %374 = vst [vmem:[#allocation2 + $0x40] sm:$0xf0] %v368_v55  ;;  %349 = vst [vmem:[#allocation2 + $0x40] sm:$0xf] %v343_v56  ;;  %1382 = vmatprep.subr.msk.mxu1 %vm498_vm6, %v464_v57  ;;  %v1500_v58 = vpop.permute.xlu1 %1499  ;;  %v1495_v59 = vpop.permute.xlu0 %1494  ;;  %v787_v55 = vunpack.c.h.bf16 %v1339_v46  ;;  %v786_v56 = vunpack.c.l.bf16 %v1339_v46 }
  0x9c   : > { %v1502_v60 = vunpack.i.h.bf16 %v1500_v58  ;;  %v1501_v61 = vunpack.i.l.bf16 %v1500_v58  ;;  %v1497_v62 = vunpack.i.h.bf16 %v1495_v59  ;;  %v1496_v63 = vunpack.i.l.bf16 %v1495_v59  ;;  %1383 = vmatpush3.msk.msra.mxu1 %vm498_vm6, %v464_v57 }
  0x9e   : > { %v416_v0 = vsel %vm415_vm2, %v1502_v60, %v1501_v61  ;;  %v417_v1 = vsel %vm415_vm2, %v1501_v61, %v1476_v37  ;;  %v391_v2 = vsel %vm390_vm3, %v1497_v62, %v1496_v63  ;;  %v392_v3 = vsel %vm390_vm3, %v1496_v63, %v1471_v45  ;;  %v463_v4 = vld [vmem:[#allocation2 + $0x70] sm:$0xf]  ;;  %v462_v6 = vld [vmem:[#allocation2 + $0x60] sm:$0xf] }
  0x9f   : > { %v461_v5 = vld [vmem:[#allocation2 + $0x38] sm:$0xff]  ;;  %422 = vst [vmem:[#allocation2 + $0x20] sm:$0xf0] %v416_v0  ;;  %423 = vst [vmem:[#allocation2 + $0x10] sm:$0xf0] %v417_v1  ;;  %1328 = vmatprep.subr.msk.mxu0 %vm498_vm6, %v463_v4  ;;  %v1510_v7 = vpop.permute.xlu1 %1509  ;;  %v1505_v8 = vpop.permute.xlu0 %1504  ;;  %v1848_v1 = vld [vmem:[%s2060_s1 + $0x8] sm:$0xff]  ;;  %v789_v4 = vcombine.high %v786_v56, %v786_v56 }
  0xa0   : > { %397 = vst [vmem:[#allocation2 + $0x20] sm:$0xf] %v391_v2  ;;  %398 = vst [vmem:[#allocation2 + $0x10] sm:$0xf] %v392_v3  ;;  %1384 = vmatprep.subr.mxu1 %v461_v5  ;;  %v1512_v9 = vunpack.i.h.bf16 %v1510_v7  ;;  %v1511_v10 = vunpack.i.l.bf16 %v1510_v7  ;;  %v1507_v11 = vunpack.i.h.bf16 %v1505_v8  ;;  %v1506_v12 = vunpack.i.l.bf16 %v1505_v8  ;;  %1329 = vmatpush1.msk.msra.mxu0 %vm498_vm6, %v462_v6 }
  0xa1   : > { %1385 = vmatpush3.msra.mxu1 %v461_v5  ;;  %v1855_v5 = vld [vmem:[%s2060_s1 + $0x10] sm:$0xff] }
  0xa2   : > { %v318_v13 = vsel %vm315_vm7, %v1511_v10, %v1512_v9  ;;  %v293_v14 = vsel %vm290_vm8, %v1506_v12, %v1507_v11  ;;  %v458_v15 = vld [vmem:[#allocation2 + $0x40] sm:$0xff] }
  0xa3   : > { %324 = vst [vmem:[#allocation2 + $0x68] sm:$0xf0] %v318_v13  ;;  %299 = vst [vmem:[#allocation2 + $0x68] sm:$0xf] %v293_v14  ;;  %1386 = vmatprep.subr.mxu1 %v458_v15  ;;  %v1520_v16 = vpop.permute.xlu1 %1519  ;;  %v1515_v17 = vpop.permute.xlu0 %1514 }
  0xa4   : > { %v1522_v18 = vunpack.i.h.bf16 %v1520_v16  ;;  %v1521_v19 = vunpack.i.l.bf16 %v1520_v16  ;;  %v1517_v20 = vunpack.i.h.bf16 %v1515_v17  ;;  %v1516_v21 = vunpack.i.l.bf16 %v1515_v17  ;;  %1387 = vmatpush3.msra.mxu1 %v458_v15 }
  0xa6   : > { %v366_v22 = vsel %vm365_vm4, %v1522_v18, %v1521_v19  ;;  %v367_v25 = vsel %vm365_vm4, %v1521_v19, %v1491_v52  ;;  %v341_v26 = vsel %vm340_vm5, %v1517_v20, %v1516_v21  ;;  %v342_v27 = vsel %vm340_vm5, %v1516_v21, %v1486_v54 }
  0xa7   : > { %v460_v28 = vld [vmem:[#allocation2 + $0x10] sm:$0xff]  ;;  %v459_v29 = vld [vmem:[#allocation2 + $0x20] sm:$0xff]  ;;  %372 = vst [vmem:[#allocation2 + $0x8] sm:$0xf0] %v366_v22  ;;  %373 = vst [vmem:[#allocation2 + $0x48] sm:$0xf0] %v367_v25  ;;  %v1530_v30 = vpop.permute.xlu1 %1529  ;;  %v1525_v31 = vpop.permute.xlu0 %1524 }
  0xa8   : > { %347 = vst [vmem:[#allocation2 + $0x8] sm:$0xf] %v341_v26  ;;  %348 = vst [vmem:[#allocation2 + $0x48] sm:$0xf] %v342_v27  ;;  %532 = vmatprep.subr.mxu0 %v460_v28  ;;  %v1532_v32 = vunpack.i.h.bf16 %v1530_v30  ;;  %v1531_v33 = vunpack.i.l.bf16 %v1530_v30  ;;  %v1527_v34 = vunpack.i.h.bf16 %v1525_v31  ;;  %v1526_v35 = vunpack.i.l.bf16 %v1525_v31 }
  0xa9   : > { %533 = vmatpush1.msra.mxu0 %v459_v29 }
  0xaa   : > { %v291_v36 = vsel %vm290_vm8, %v1532_v32, %v1531_v33  ;;  %v292_v37 = vsel %vm290_vm8, %v1531_v33, %v1506_v12  ;;  %v268_v38 = vsel %vm265_vm9, %v1526_v35, %v1527_v34  ;;  %v455_v39 = vld [vmem:[#allocation2 + $0x68] sm:$0xff] }
  0xab   : > { %297 = vst [vmem:[#allocation2 + $0x18] sm:$0xf] %v291_v36  ;;  %298 = vst [vmem:[#allocation2 + $0x50] sm:$0xf] %v292_v37  ;;  %1388 = vmatprep.subr.mxu1 %v455_v39  ;;  %v1535_v40 = vpop.permute.xlu0 %1534  ;;  %v1540_v41 = vpop.permute.xlu1 %1539 }
  0xac   : > { %274 = vst [vmem:[#allocation2 + $0x58] sm:$0xf0] %v268_v38  ;;  %v1537_v42 = vunpack.i.h.bf16 %v1535_v40  ;;  %v1536_v43 = vunpack.i.l.bf16 %v1535_v40  ;;  %v1542_v44 = vunpack.i.h.bf16 %v1540_v41  ;;  %v1541_v45 = vunpack.i.l.bf16 %v1540_v41  ;;  %1389 = vmatpush3.msra.mxu1 %v455_v39 }
  0xae   : > { %v316_v47 = vsel %vm315_vm7, %v1537_v42, %v1536_v43  ;;  %v317_v48 = vsel %vm315_vm7, %v1536_v43, %v1511_v10  ;;  %v266_v49 = vsel %vm265_vm9, %v1542_v44, %v1541_v45  ;;  %v267_v50 = vsel %vm265_vm9, %v1541_v45, %v1526_v35  ;;  %v1864_v10 = vld [vmem:[%s2060_s1 + $0x18] sm:$0xff] }
  0xaf   : > { %v457_v51 = vld [vmem:[#allocation2 + $0x48] sm:$0xff]  ;;  %322 = vst [vmem:[#allocation2 + $0x18] sm:$0xf0] %v316_v47  ;;  %323 = vst [vmem:[#allocation2 + $0x50] sm:$0xf0] %v317_v48  ;;  %v1545_v53 = vpop.permute.xlu0 %1544  ;;  %v1550_v54 = vpop.permute.xlu1 %1549 }
  0xb0   : > { %v456_v52 = vld [vmem:[#allocation2 + $0x8] sm:$0xff]  ;;  %272 = vst [vmem:[#allocation2 + $0x30] sm:$0xf0] %v266_v49  ;;  %273 = vst [vmem:[#allocation2] sm:$0xf0] %v267_v50  ;;  %534 = vmatprep.subr.mxu0 %v457_v51  ;;  %v1547_v57 = vunpack.i.h.bf16 %v1545_v53  ;;  %v1546_v58 = vunpack.i.l.bf16 %v1545_v53  ;;  %v1552_v59 = vunpack.i.h.bf16 %v1550_v54  ;;  %v1551_v60 = vunpack.i.l.bf16 %v1550_v54 }
  0xb1   : > { %535 = vmatpush1.msra.mxu0 %v456_v52 }
  0xb2   : > { %v978_v61 = vsel %vm440_vm1, %v1546_v58, %v1547_v57  ;;  %v979_v62 = vsel %vm440_vm1, %v1547_v57, %v1552_v59  ;;  %v977_v63 = vsel %vm440_vm1, %v1551_v60, %v1546_v58 }
  0xb3   : > { %v452_v0 = vld [vmem:[#allocation2 + $0x58] sm:$0xff]  ;;  %984 = vst [vmem:[#allocation2 + $0x70] sm:$0xf] %v978_v61  ;;  %985 = vst [vmem:[#allocation2 + $0x28] sm:$0xf] %v979_v62  ;;  %v1555_v2 = vpop.permute.xlu0 %1554  ;;  %v1850_v3 = vpop.permute.xlu1 %1559 }
  0xb4   : > { %983 = vst [vmem:[#allocation2 + $0x60] sm:$0xf] %v977_v63  ;;  %1390 = vmatprep.subr.mxu1 %v452_v0  ;;  %793 = vst [vmem:[#allocation2 + $0x58] sm:$0xf] %v787_v55  ;;  %v1557_v6 = vunpack.i.h.bf16 %v1555_v2  ;;  %v1556_v7 = vunpack.i.l.bf16 %v1555_v2  ;;  %v1562_v8 = vunpack.i.h.bf16 %v1850_v3  ;;  %v1561_v9 = vunpack.i.l.bf16 %v1850_v3 }
  0xb5   : > { %1391 = vmatpush3.msra.mxu1 %v452_v0 }
  0xb6   : > { %1393 = vmatmul.mubr.msk.f32.vlgmr.msra.gmra.mxu1 %vm485_vm0, %v1848_v1  ;;  %v930_v11 = vsel %vm390_vm3, %v1556_v7, %v1557_v6  ;;  %v954_v12 = vsel %vm415_vm2, %v1561_v9, %v1562_v8  ;;  %v454_v13 = vld [vmem:[#allocation2 + $0x50] sm:$0xff]  ;;  %v453_v14 = vld [vmem:[#allocation2 + $0x18] sm:$0xff] }
  0xb7   : > { %v451_v15 = vld [vmem:[#allocation2] sm:$0xff]  ;;  %1395 = vmatprep.mubr.msk.f32.mxu1 %vm485_vm0, %v1855_v5  ;;  %936 = vst [vmem:[#allocation2 + $0x10] sm:$0xf] %v930_v11  ;;  %960 = vst [vmem:[#allocation2 + $0x10] sm:$0xf0] %v954_v12  ;;  %v1565_v16 = vpop.permute.xlu0 %1564  ;;  %536 = vmatprep.subr.mxu0 %v454_v13  ;;  %v946_v17 = vpop.permute.xlu1 %945  ;;  %v450_v18 = vld [vmem:[#allocation2 + $0x30] sm:$0xff] }
  0xb8   : > { %792 = vst [vmem:[#allocation2] sm:$0xf] %v789_v4  ;;  %v1567_v19 = vunpack.i.h.bf16 %v1565_v16  ;;  %v1566_v20 = vunpack.i.l.bf16 %v1565_v16  ;;  %v953_v21 = vsel %vm415_vm2, %v946_v17, %v1561_v9  ;;  %537 = vmatpush1.msra.mxu0 %v453_v14  ;;  %791 = vst [vmem:[#allocation2 + $0x30] sm:$0xf] %v786_v56 }
  0xb9   : > { %959 = vst [vmem:[#allocation2 + $0x20] sm:$0xf0] %v953_v21  ;;  %538 = vmatprep.subr.mxu0 %v451_v15 }
  0xba   : > { %1396 = vmatmul.mubr.msk.f32.gmra.mxu1 %vm485_vm0, %v1864_v10  ;;  %v929_v22 = vsel %vm390_vm3, %v1566_v20, %v1556_v7  ;;  %v931_v25 = vsel %vm390_vm3, %v1557_v6, %v1567_v19  ;;  %539 = vmatpush1.msra.mxu0 %v450_v18  ;;  %v999_v26 = vld [vmem:[#allocation2 + $0x70] sm:$0xf]  ;;  %v1000_v27 = vld [vmem:[#allocation2 + $0x28] sm:$0xf]  ;;  %vm767_vm3 = vcmask 97280  }
  0xbb   : > { %v998_v28 = vld [vmem:[#allocation2 + $0x60] sm:$0xf]  ;;  %1074 = vmatprep.mubr.f32.mxu1 %v1665_v24  ;;  %935 = vst [vmem:[#allocation2 + $0x20] sm:$0xf] %v929_v22  ;;  %937 = vst [vmem:[#allocation2 + $0x38] sm:$0xf] %v931_v25  ;;  %v1878_v29 = vpop.permute.xlu0 %1569  ;;  %v1880_v30 = vpop.permute.xlu1 %1574  ;;  %1348 = vmatprep.subr.msk.mxu1 %vm498_vm6, %v999_v26 }
  0xbc   : > { %1398 = vmatprep.subr.msk.mxu0 %vm498_vm6, %v1000_v27  ;;  %v1572_v31 = vunpack.i.h.bf16 %v1878_v29  ;;  %v1571_v32 = vunpack.i.l.bf16 %v1878_v29  ;;  %v1577_v33 = vunpack.i.h.bf16 %v1880_v30  ;;  %v1576_v34 = vunpack.i.l.bf16 %v1880_v30  ;;  %1330 = vmatmul.mubr.msk.f32.vlgmr.msra.gmra.mxu0 %vm485_vm0, %v1774_v23 }
  0xbd   : > { %1349 = vmatpush1.msk.msra.mxu1 %vm498_vm6, %v998_v28  ;;  %1399 = vmatpush3.msk.msra.mxu0 %vm498_vm6, %v1000_v27 }
  0xbe   : > { %578 = vmatprep.mubr.f32.mxu0 %v1665_v24  ;;  %v882_v35 = vsel %vm340_vm5, %v1571_v32, %v1572_v31  ;;  %v906_v36 = vsel %vm365_vm4, %v1576_v34, %v1577_v33  ;;  %v996_v37 = vld [vmem:[#allocation2 + $0x10] sm:$0xff] }
  0xbf   : > { %888 = vst [vmem:[#allocation2 + $0x48] sm:$0xf] %v882_v35  ;;  %912 = vst [vmem:[#allocation2 + $0x48] sm:$0xf0] %v906_v36  ;;  %v874_v38 = vpop.permute.xlu0 %873  ;;  %v898_v39 = vpop.permute.xlu1 %897  ;;  %1034 = vmatprep.subr.mxu1 %v996_v37 }
  0xc0   : > { %v881_v40 = vsel %vm340_vm5, %v874_v38, %v1571_v32  ;;  %v905_v41 = vsel %vm365_vm4, %v898_v39, %v1576_v34  ;;  %1331 = vmatmul.mubr.msk.f32.gmra.mxu0 %vm485_vm0, %v1848_v1 }
  0xc1   : > { %887 = vst [vmem:[#allocation2 + $0x8] sm:$0xf] %v881_v40  ;;  %911 = vst [vmem:[#allocation2 + $0x8] sm:$0xf0] %v905_v41  ;;  %584 = vmatprep.mubr.f32.mxu0 %v1665_v24 }
  0xc2   : > { %v995_v42 = vld [vmem:[#allocation2 + $0x20] sm:$0xff] }
  0xc3   : > { %v1580_v43 = vpop.permute.xlu0 %1579  ;;  %v1585_v44 = vpop.permute.xlu1 %1584  ;;  %1035 = vmatpush1.msra.mxu1 %v995_v42 }
  0xc4   : > { %v1582_v45 = vunpack.i.h.bf16 %v1580_v43  ;;  %v1581_v46 = vunpack.i.l.bf16 %v1580_v43  ;;  %v1587_v47 = vunpack.i.h.bf16 %v1585_v44  ;;  %v1586_v48 = vunpack.i.l.bf16 %v1585_v44  ;;  %1332 = vmatmul.mubr.msk.f32.gmra.mxu0 %vm485_vm0, %v1855_v5 }
  0xc5   : > { %590 = vmatprep.mubr.f32.mxu0 %v1665_v24 }
  0xc6   : > { %v834_v49 = vsel %vm290_vm8, %v1581_v46, %v1582_v45  ;;  %v858_v50 = vsel %vm315_vm7, %v1586_v48, %v1587_v47  ;;  %v993_v51 = vld [vmem:[#allocation2 + $0x48] sm:$0xff] }
  0xc7   : > { %840 = vst [vmem:[#allocation2 + $0x50] sm:$0xf] %v834_v49  ;;  %864 = vst [vmem:[#allocation2 + $0x50] sm:$0xf0] %v858_v50  ;;  %v826_v52 = vpop.permute.xlu0 %825  ;;  %v850_v53 = vpop.permute.xlu1 %849  ;;  %1036 = vmatprep.subr.mxu1 %v993_v51 }
  0xc8   : > { %v833_v54 = vsel %vm290_vm8, %v826_v52, %v1581_v46  ;;  %v857_v55 = vsel %vm315_vm7, %v850_v53, %v1586_v48  ;;  %v992_v56 = vld [vmem:[#allocation2 + $0x8] sm:$0xff]  ;;  %1333 = vmatmul.mubr.msk.f32.gmra.mxu0 %vm485_vm0, %v1864_v10 }
  0xc9   : > { %839 = vst [vmem:[#allocation2 + $0x18] sm:$0xf] %v833_v54  ;;  %863 = vst [vmem:[#allocation2 + $0x18] sm:$0xf0] %v857_v55  ;;  %1037 = vmatpush1.msra.mxu1 %v992_v56  ;;  %1408 = vmatprep.mubr.msk.f32.mxu0 %vm485_vm0, %v1774_v23 }
  0xcb   : > { %v1590_v57 = vpop.permute.xlu0 %1589  ;;  %v802_v58 = vpop.permute.xlu1 %801 }
  0xcc   : > { %v1592_v59 = vunpack.i.h.bf16 %v1590_v57  ;;  %v1591_v60 = vunpack.i.l.bf16 %v1590_v57 }
  0xce   : > { %v810_v61 = vsel %vm265_vm9, %v1591_v60, %v1592_v59  ;;  %v809_v62 = vsel %vm265_vm9, %v802_v58, %v1591_v60  ;;  %v990_v63 = vld [vmem:[#allocation2 + $0x50] sm:$0xff] }
  0xcf   : > { %816 = vst [vmem:[#allocation2] sm:$0xf0] %v810_v61  ;;  %815 = vst [vmem:[#allocation2 + $0x30] sm:$0xf0] %v809_v62  ;;  %v952_v0 = vpop.permute.xlu0 %951  ;;  %v880_v2 = vpop.permute.xlu1 %879  ;;  %1038 = vmatprep.subr.mxu1 %v990_v63 }
  0xd0   : > { %v955_v4 = vsel %vm415_vm2, %v1562_v8, %v952_v0  ;;  %v883_v6 = vsel %vm340_vm5, %v1572_v31, %v880_v2  ;;  %v989_v7 = vld [vmem:[#allocation2 + $0x18] sm:$0xff] }
  0xd1   : > { %961 = vst [vmem:[#allocation2 + $0x38] sm:$0xf0] %v955_v4  ;;  %889 = vst [vmem:[#allocation2 + $0x40] sm:$0xf] %v883_v6  ;;  %1039 = vmatpush1.msra.mxu1 %v989_v7 }
  0xd3   : > { %v904_v9 = vpop.permute.xlu0 %903  ;;  %v832_v11 = vpop.permute.xlu1 %831 }
  0xd4   : > { %v907_v12 = vsel %vm365_vm4, %v1577_v33, %v904_v9  ;;  %v835_v13 = vsel %vm290_vm8, %v1582_v45, %v832_v11  ;;  %vm782_vm4 = vcmask 90112  }
  0xd5   : > { %913 = vst [vmem:[#allocation2 + $0x40] sm:$0xf0] %v907_v12  ;;  %841 = vst [vmem:[#allocation2 + $0x68] sm:$0xf] %v835_v13 }
  0xd6   : > { %v987_v14 = vld [vmem:[#allocation2] sm:$0xff]  ;;  %v986_v3 = vld [vmem:[#allocation2 + $0x30] sm:$0xff] }
  0xd7   : > { %v856_v15 = vpop.permute.xlu0 %855  ;;  %v808_v8 = vpop.permute.xlu1 %807  ;;  %1040 = vmatprep.subr.mxu1 %v987_v14 }
  0xd8   : > { %v859_v16 = vsel %vm315_vm7, %v1587_v47, %v856_v15  ;;  %v811_v17 = vsel %vm265_vm9, %v1592_v59, %v808_v8  ;;  %1041 = vmatpush1.msra.mxu1 %v986_v3  ;;  %v997_v18 = vld [vmem:[#allocation2 + $0x38] sm:$0xff] }
  0xd9   : > { %865 = vst [vmem:[#allocation2 + $0x68] sm:$0xf0] %v859_v16  ;;  %817 = vst [vmem:[#allocation2 + $0x58] sm:$0xf0] %v811_v17  ;;  %1350 = vmatmul.mubr.msk.f32.vlgmr.msra.gmra.mxu1 %vm485_vm0, %v1774_v23  ;;  %1400 = vmatprep.subr.mxu0 %v997_v18  ;;  %v694_v23 = vlaneseq }
  0xda   : > { %1401 = vmatpush3.msra.mxu0 %v997_v18  ;;  %1080 = vmatprep.mubr.f32.mxu1 %v1665_v24 }
  0xdb   : > { %v695_v22 = vand.u32 127, %v694_v23 }
  0xdc   : > { %v994_v19 = vld [vmem:[#allocation2 + $0x40] sm:$0xff] }
  0xdd   : > { %1351 = vmatmul.mubr.msk.f32.gmra.mxu1 %vm485_vm0, %v1848_v1  ;;  %1402 = vmatprep.subr.mxu0 %v994_v19  ;;  %v696_v25 = vadd.s32 128, %v695_v22  ;;  %v697_v26 = vadd.s32 256, %v695_v22  ;;  %v698_v27 = vcvt.s32.f32 %v695_v22 }
  0xde   : > { %1403 = vmatpush3.msra.mxu0 %v994_v19  ;;  %1086 = vmatprep.mubr.f32.mxu1 %v1665_v24 }
  0xdf   : > { %v699_v28 = vcvt.s32.f32 %v696_v25  ;;  %v700_v29 = vcvt.s32.f32 %v697_v26  ;;  %v704_v30 = vadd.f32 0.5, %v698_v27  ;;  %vm719_vm10 = vcmp.lt.f32.partialorder %v698_v27, 286.0 }
  0xe0   : > { %v991_v20 = vld [vmem:[#allocation2 + $0x68] sm:$0xff]  ;;  %v988_v21 = vld [vmem:[#allocation2 + $0x58] sm:$0xff] }
  0xe1   : > { %1352 = vmatmul.mubr.msk.f32.gmra.mxu1 %vm485_vm0, %v1855_v5  ;;  %1404 = vmatprep.subr.mxu0 %v991_v20  ;;  %v705_v31 = vadd.f32 0.5, %v699_v28  ;;  %v706_v32 = vadd.f32 0.5, %v700_v29  ;;  %v707_v33 = vmul.f32 0.055555556, %v704_v30  ;;  %vm720_vm12 = vcmp.lt.f32.partialorder %v699_v28, 286.0 }
  0xe2   : > { %1405 = vmatpush3.msra.mxu0 %v991_v20  ;;  %1092 = vmatprep.mubr.f32.mxu1 %v1665_v24  ;;  %vm721_vm14 = vcmp.lt.f32.partialorder %v700_v29, 286.0 }
  0xe3   : > { %1406 = vmatprep.subr.mxu0 %v988_v21  ;;  %v708_v34 = vmul.f32 0.055555556, %v705_v31  ;;  %v709_v35 = vmul.f32 0.055555556, %v706_v32 }
  0xe4   : > { %1407 = vmatpush3.msra.mxu0 %v988_v21  ;;  %v1942_v44 = vpop.permute.xlu0 %467  ;;  %v1944_v45 = vpop.permute.xlu1 %472 }
  0xe5   : > { %1353 = vmatmul.mubr.msk.f32.gmra.mxu1 %vm485_vm0, %v1864_v10  ;;  %1409 = vmatmul.mubr.msk.f32.vlgmr.msra.gmra.mxu0 %vm485_vm0, %v1848_v1  ;;  %v710_v1 = vfloor.f32 %v707_v33  ;;  %v711_v36 = vfloor.f32 %v708_v34  ;;  %v712_v37 = vfloor.f32 %v709_v35 }
  0xe6   : > { %1411 = vmatprep.mubr.msk.f32.mxu0 %vm485_vm0, %v1855_v5 }
  0xe7   : > { %v713_v5 = vmul.f32 18.0, %v710_v1  ;;  %v714_v38 = vmul.f32 18.0, %v711_v36  ;;  %v715_v39 = vmul.f32 18.0, %v712_v37 }
  0xe8   : > { %v1955_v58 = vpop.permute.xlu1 %477  ;;  %v483_v1 = vpop.permute.xlu0 %482 }
  0xe9   : > { %1412 = vmatmul.mubr.msk.f32.gmra.mxu0 %vm485_vm0, %v1864_v10  ;;  %v716_v40 = vsub.f32 %v698_v27, %v713_v5  ;;  %v717_v42 = vsub.f32 %v699_v28, %v714_v38  ;;  %v718_v43 = vsub.f32 %v700_v29, %v715_v39 }
  0xeb   : > { %vm722_vm11 = vcmp.lt.f32.partialorder %v716_v40, 16.0  ;;  %vm723_vm13 = vcmp.lt.f32.partialorder %v717_v42, 16.0  ;;  %vm724_vm15 = vcmp.lt.f32.partialorder %v718_v43, 16.0 }
  0xec   : > { %vm725_vm0 = vmand %vm719_vm10, %vm722_vm11 }
  0xed   : > { %vm726_vm1 = vmand %vm720_vm12, %vm723_vm13  ;;  %v1953_v57 = vsel %vm725_vm0, 1.0, %v1665_v24 }
  0xee   : > { %vm727_vm2 = vmand %vm721_vm14, %vm724_vm15  ;;  %v1960_v63 = vsel %vm726_vm1, 1.0, %v1665_v24 }
  0xef   : > { %v1963_v2 = vsel %vm727_vm2, 1.0, %v1665_v24 }
 0x176   : > { %v1394_v10 = vpop.f32.mrf.mxu1 }
 0x177   : > { %v669_v51 = vadd.f32 %v1394_v10, %v1944_v45 }
 0x178   : > { %v663_v41 = vpop.f32.mrf.mxu1 }
 0x179   : > { %v664_v47 = vadd.f32 %v663_v41, %v1942_v44  ;;  %v687_v0 = vmax.f32 %v669_v51, 0.0 }
 0x17a   : > { %v1946_v46 = vpop.f32.mrf.mxu1 }
 0x17b   : > { %v684_v55 = vmax.f32 %v664_v47, 0.0  ;;  %v736_v24 = vmul.f32 %v1963_v2, %v687_v0 }
 0x17c   : > { %v574_v48 = vpop.f32.mrf.mxu0  ;;  %v673_v52 = vpop.f32.mrf.mxu1 }
 0x17d   : > { %v575_v49 = vadd.f32 %v574_v48, %v1942_v44  ;;  %v674_v4 = vadd.f32 %v673_v52, %v1955_v58  ;;  %v733_v11 = vmul.f32 %v1963_v2, %v684_v55 }
 0x17e   : > { %v576_v50 = vpop.f32.mrf.mxu0 }
 0x17f   : > { %v577_v53 = vadd.f32 %v576_v50, %v1942_v44  ;;  %v682_v54 = vmax.f32 %v575_v49, 0.0  ;;  %v690_v16 = vmax.f32 %v674_v4, 0.0 }
 0x180   : > { %v580_v56 = vpop.f32.mrf.mxu0 }
 0x181   : > { %v581_v59 = vadd.f32 %v580_v56, %v1944_v45  ;;  %v683_v60 = vmax.f32 %v577_v53, 0.0  ;;  %v731_v61 = vmul.f32 %v1953_v57, %v682_v54  ;;  %v739_v27 = vmul.f32 %v1963_v2, %v690_v16 }
 0x182   : > { %v582_v62 = vpop.f32.mrf.mxu0 }
 0x183   : > { %v583_v6 = vadd.f32 %v582_v62, %v1944_v45  ;;  %v685_v7 = vmax.f32 %v581_v59, 0.0  ;;  %v732_v9 = vmul.f32 %v1960_v63, %v683_v60 }
 0x184   : > { %v586_v12 = vpop.f32.mrf.mxu0 }
 0x185   : > { %v686_v13 = vmax.f32 %v583_v6, 0.0  ;;  %v734_v14 = vmul.f32 %v1953_v57, %v685_v7  ;;  %v743_v3 = vadd.f32 %v732_v9, %v731_v61  ;;  %v587_v15 = vadd.f32 %v586_v12, %v1955_v58 }
 0x186   : > { %v588_v8 = vpop.f32.mrf.mxu0  ;;  %v679_v61 = vadd.f32 %v1946_v46, %v483_v1 }
 0x187   : > { %v735_v17 = vmul.f32 %v1960_v63, %v686_v13  ;;  %v744_v18 = vadd.f32 %v743_v3, %v733_v11  ;;  %v589_v19 = vadd.f32 %v588_v8, %v1955_v58  ;;  %v688_v20 = vmax.f32 %v587_v15, 0.0 }
 0x188   : > { %v592_v32 = vpop.f32.mrf.mxu0 }
 0x189   : > { %v747_v21 = vadd.f32 %v735_v17, %v734_v14  ;;  %745 = vadd.xlane.f32.xlu1 %v744_v18  ;;  %v689_v23 = vmax.f32 %v589_v19, 0.0  ;;  %v737_v22 = vmul.f32 %v1953_v57, %v688_v20  ;;  %v593_v43 = vadd.f32 %v592_v32, %v483_v1 }
 0x18a   : > { %v594_v36 = vpop.f32.mrf.mxu0  ;;  %v693_v17 = vmax.f32 %v679_v61, 0.0 }
 0x18b   : > { %v748_v25 = vadd.f32 %v747_v21, %v736_v24  ;;  %v738_v26 = vmul.f32 %v1960_v63, %v689_v23  ;;  %v595_v41 = vadd.f32 %v594_v36, %v483_v1  ;;  %v691_v62 = vmax.f32 %v593_v43, 0.0 }
 0x18d   : > { %749 = vadd.xlane.f32.xlu0 %v748_v25  ;;  %v751_v28 = vadd.f32 %v738_v26, %v737_v22  ;;  %v692_v56 = vmax.f32 %v595_v41, 0.0  ;;  %v740_v18 = vmul.f32 %v1953_v57, %v691_v62 }
 0x18f   : > { %v752_v29 = vadd.f32 %v751_v28, %v739_v27  ;;  %v741_v46 = vmul.f32 %v1960_v63, %v692_v56 }
 0x191   : > { %753 = vadd.xlane.f32.xlu0 %v752_v29 }
 0x199   : > { %v1076_v30 = vpop.f32.mrf.mxu1 }
 0x19a   : > { %v1077_v5 = vadd.f32 %v1076_v30, %v1942_v44  ;;  %v742_v30 = vmul.f32 %v1963_v2, %v693_v17 }
 0x19b   : > { %v1078_v31 = vpop.f32.mrf.mxu1 }
 0x19c   : > { %v1079_v38 = vadd.f32 %v1078_v31, %v1942_v44  ;;  %v1184_v48 = vmax.f32 %v1077_v5, 0.0  ;;  %v755_v31 = vadd.f32 %v741_v46, %v740_v18  ;;  %v237_v5 = vld [vmem:[%s2062_s3 + $0x8] sm:$0xff] }
 0x19d   : > { %v1082_v33 = vpop.f32.mrf.mxu1 }
 0x19e   : > { %v1083_v34 = vadd.f32 %v1082_v33, %v1944_v45  ;;  %v1185_v49 = vmax.f32 %v1079_v38, 0.0  ;;  %v1196_v9 = vmul.f32 %v1184_v48, %v1953_v57  ;;  %v756_v36 = vadd.f32 %v755_v31, %v742_v30 }
 0x19f   : > { %v1084_v35 = vpop.f32.mrf.mxu1 }
 0x1a0   : > { %v1085_v37 = vadd.f32 %v1084_v35, %v1944_v45  ;;  %v1187_v10 = vmax.f32 %v1083_v34, 0.0  ;;  %v1197_v11 = vmul.f32 %v1185_v49, %v1960_v63 }
 0x1a1   : > { %v1088_v39 = vpop.f32.mrf.mxu1 }
 0x1a2   : > { %v1188_v40 = vmax.f32 %v1085_v37, 0.0  ;;  %v1089_v50 = vadd.f32 %v1088_v39, %v1955_v58  ;;  %v1199_v53 = vmul.f32 %v1187_v10, %v1953_v57  ;;  %v1208_v22 = vadd.f32 %v1197_v11, %v1196_v9 }
 0x1a3   : > { %v1090_v42 = vpop.f32.mrf.mxu1 }
 0x1a4   : > { %v1091_v47 = vadd.f32 %v1090_v42, %v1955_v58  ;;  %v1200_v54 = vmul.f32 %v1188_v40, %v1960_v63  ;;  %v1190_v12 = vmax.f32 %v1089_v50, 0.0 }
 0x1a5   : > { %v1094_v51 = vpop.f32.mrf.mxu1  ;;  %v1410_v52 = vpop.f32.mrf.mxu0 }
 0x1a6   : > { %v1171_v55 = vadd.f32 %v1410_v52, %v1944_v45  ;;  %v1191_v0 = vmax.f32 %v1091_v47, 0.0  ;;  %v1095_v4 = vadd.f32 %v1094_v51, %v483_v1  ;;  %v1212_v8 = vadd.f32 %v1200_v54, %v1199_v53  ;;  %v239_v52 = vld [vmem:[%s2062_s3 + $0x18] sm:$0xff] }
 0x1a7   : > { %v1096_v59 = vpop.f32.mrf.mxu1  ;;  %v1165_v60 = vpop.f32.mrf.mxu0  ;;  %v1202_v25 = vmul.f32 %v1190_v12, %v1953_v57 }
 0x1a8   : > { %v1189_v6 = vmax.f32 %v1171_v55, 0.0  ;;  %v1097_v7 = vadd.f32 %v1096_v59, %v483_v1  ;;  %v1166_v13 = vadd.f32 %v1165_v60, %v1942_v44  ;;  %v1203_v19 = vmul.f32 %v1191_v0, %v1960_v63 }
 0x1a9   : > { %v1413_v14 = vpop.f32.mrf.mxu0  ;;  %v1193_v20 = vmax.f32 %v1095_v4, 0.0 }
 0x1aa   : > { %v1201_v45 = vmul.f32 %v1189_v6, %v1963_v2  ;;  %v1194_v3 = vmax.f32 %v1097_v7, 0.0  ;;  %v1181_v15 = vadd.f32 %v1413_v14, %v483_v1  ;;  %v1186_v24 = vmax.f32 %v1166_v13, 0.0 }
 0x1ab   : > { %v1175_v16 = vpop.f32.mrf.mxu0  ;;  %v1205_v32 = vmul.f32 %v1193_v20, %v1953_v57  ;;  %v236_v57 = vld [vmem:[%s2062_s3] sm:$0xff] }
 0x1ac   : > { %v1176_v21 = vadd.f32 %v1175_v16, %v1955_v58  ;;  %v1213_v23 = vadd.f32 %v1212_v8, %v1201_v45  ;;  %v1198_v44 = vmul.f32 %v1186_v24, %v1963_v2  ;;  %v1206_v26 = vmul.f32 %v1194_v3, %v1960_v63 }
 0x1ad   : > { %v1195_v27 = vmax.f32 %v1181_v15, 0.0  ;;  %v1216_v58 = vadd.f32 %v1203_v19, %v1202_v25  ;;  %v240_v19 = vld [vmem:[%s2063_s4] sm:$0x1] }
 0x1ae   : > { %v1192_v28 = vmax.f32 %v1176_v21, 0.0  ;;  %1214 = vadd.xlane.f32.xlu1 %v1213_v23  ;;  %v1209_v29 = vadd.f32 %v1208_v22, %v1198_v44  ;;  %v1220_v1 = vadd.f32 %v1206_v26, %v1205_v32 }
 0x1af   : > { %v1207_v34 = vmul.f32 %v1195_v27, %v1963_v2 }
 0x1b0   : > { %v1204_v33 = vmul.f32 %v1192_v28, %v1963_v2  ;;  %1210 = vadd.xlane.f32.xlu0 %v1209_v29  ;;  %v238_v2 = vld [vmem:[%s2062_s3 + $0x10] sm:$0xff] }
 0x1b1   : > { %v1221_v63 = vadd.f32 %v1220_v1, %v1207_v34 }
 0x1b2   : > { %v1217_v35 = vadd.f32 %v1216_v58, %v1204_v33 }
 0x1b4   : > { %1218 = vadd.xlane.f32.xlu1 %v1217_v35  ;;  %757 = vadd.xlane.f32.xlu0 %v756_v36 }
 0x1b8   : > { %1222 = vadd.xlane.f32.xlu1 %v1221_v63 }
 0x212   : > { %v746_v38 = vpop.xlane.xlu1 %745 }
 0x213   : > { %v763_v10 = vmul.f32 %v746_v38, %v236_v57 }
 0x215   : > { %v768_v42 = vsel %vm767_vm3, %v763_v10, 0.0 }
 0x216   : > { %v750_v37 = vpop.xlane.xlu0 %749 }
 0x217   : > { %v764_v39 = vmul.f32 %v750_v37, %v237_v5 }
 0x219   : > { %v769_v41 = vsel %vm767_vm3, %v764_v39, 0.0 }
 0x21a   : > { %v754_v40 = vpop.xlane.xlu0 %753  ;;  %v770_v50 = vadd.f32 %v769_v41, %v768_v42 }
 0x21b   : > { %v765_v43 = vmul.f32 %v754_v40, %v238_v2 }
 0x21d   : > { %v771_v53 = vsel %vm767_vm3, %v765_v43, 0.0 }
 0x21e   : > { %v772_v61 = vadd.f32 %v771_v53, %v770_v50 }
 0x237   : > { %v1215_v47 = vpop.xlane.xlu1 %1214 }
 0x238   : > { %v1229_v51 = vmul.f32 %v1215_v47, %v237_v5 }
 0x239   : > { %v1211_v48 = vpop.xlane.xlu0 %1210 }
 0x23a   : > { %v1228_v49 = vmul.f32 %v1211_v48, %v236_v57  ;;  %v1233_v62 = vsel %vm767_vm3, %v1229_v51, 0.0 }
 0x23c   : > { %v1232_v55 = vsel %vm767_vm3, %v1228_v49, 0.0 }
 0x23d   : > { %v1219_v54 = vpop.xlane.xlu1 %1218  ;;  %v758_v56 = vpop.xlane.xlu0 %757  ;;  %v1234_v4 = vadd.f32 %v1233_v62, %v1232_v55 }
 0x23e   : > { %v1230_v59 = vmul.f32 %v1219_v54, %v238_v2  ;;  %v766_v60 = vmul.f32 %v758_v56, %v239_v52 }
 0x240   : > { %v1235_v0 = vsel %vm767_vm3, %v1230_v59, 0.0  ;;  %v773_v6 = vsel %vm767_vm3, %v766_v60, 0.0 }
 0x241   : > { %v1223_v7 = vpop.xlane.xlu1 %1222  ;;  %v774_v9 = vadd.f32 %v773_v6, %v772_v61  ;;  %v1236_v12 = vadd.f32 %v1235_v0, %v1234_v4 }
 0x242   : > { %v1231_v11 = vmul.f32 %v1223_v7, %v239_v52 }
 0x243   : > { %v775_v13 = vrot.slane %v774_v9, 4 }
 0x244   : > { %v1237_v14 = vsel %vm767_vm3, %v1231_v11, 0.0 }
 0x245   : > { %v1238_v45 = vadd.f32 %v1237_v14, %v1236_v12  ;;  %v776_v3 = vadd.f32 %v775_v13, %v774_v9 }
 0x247   : > { %v1239_v15 = vrot.slane %v1238_v45, 4  ;;  %v777_v8 = vrot.slane %v776_v3, 2 }
 0x249   : > { %v1240_v46 = vadd.f32 %v1239_v15, %v1238_v45  ;;  %v778_v24 = vadd.f32 %v777_v8, %v776_v3 }
 0x24b   : > { %v1241_v16 = vrot.slane %v1240_v46, 2  ;;  %v779_v17 = vrot.slane %v778_v24, 1 }
 0x24d   : > { %v1242_v18 = vadd.f32 %v1241_v16, %v1240_v46  ;;  %v780_v20 = vadd.f32 %v779_v17, %v778_v24 }
 0x24f   : > { %v1243_v21 = vrot.slane %v1242_v18, 1  ;;  %v781_v23 = vadd.f32 %v780_v20, %v240_v19 }
 0x251   : > { %v1244_v44 = vadd.f32 %v1243_v21, %v1242_v18  ;;  %783 = vst.msk [vmem:[%s220_s15] sm:$0x1] %vm782_vm4, %v781_v23 }
 0x253   : > { %v1245_v22 = vadd.f32 %v1244_v44, %v240_v19 }
 0x255   : > { %1246 = vst.msk [vmem:[%s220_s15 + $0x1] sm:$0x1] %vm782_vm4, %v1245_v22 }
 0x256   : > { %1608 = shalt.err (!%p1605_p3)
}
 0x257   : > { %s1609_s8 = scalar_lea.hbm %s1259_s25, 32  ;;  %s1613_s12 = scalar_lea.hbm %s2064_s5, 64 }
 0x258   : > { %p1610_p4 = scmp.ne.s32.totalorder %s1259_s25, %s1609_s8  ;;  %p1614_p9 = scmp.lt.s32.totalorder %s1259_s25, %s2064_s5 }
 0x259   : > { %p1615_p10 = scmp.lt.s32.totalorder %s1613_s12, %s1609_s8 }
 0x25a   : > { %p1611_p7 = pnand %p1610_p4, %p1736_p5 }
 0x25b   : > { %p1616_p11 = por %p1615_p10, %p1614_p9 }
 0x25c   : > { %p1612_p8 = pneg %p1611_p7 }
 0x25e   : > { %p1617_p12 = pnand %p1616_p11, %p1612_p8 }
 0x260   : > { %1620 = shalt.err (!%p1617_p12)
}
 0x261   : > { %1414 = dma.vmem_to_hbm [thread:$0]  (%p1736_p5), %s1262_s16, 32, %s1259_s25, %s1248_s26  }
 0x262 PF: > { %p1420_p13 = scmp.ge.s32.totalorder %s1655_s21, 2  ;;  %s1273_s14 = sand.u32 1, %s1643_s18  }
 0x263   : > { %s1274_s15 = scalar_lea.sflag [#allocation4], %s1273_s14 }
 0x264   : > { %p1417_p0 = pnand %p1420_p13, %p1740_p6 }
 0x266   : > { %p1418_p1 = pneg %p1417_p0 }
 0x268   : > { %1638 = dma.done.wait (%p1418_p1), %s1274_s15, 32  }
 0x269   : > { %1640 = vsyncadd (%p1418_p1), %s1274_s15, 4294967264  ;;  %p15_p2 = scmp.ge.s32.totalorder %s1723_s24, 4   ;;  %s2067_s18 = smov %s1647_s19 }
 0x26a   : > { %s2068_s19 = smov %s1651_s20  ;;  %s2069_s20 = smov %s1734_s27 }
 0x26b   : > { %s2070_s21 = smov %s1723_s24  ;;  %17 = sbr.rel (!%p15_p2) target bundleno = 3 (0x3), region = 76 }
 0x270   :  { %1279 = vsyncpa [#allocation4], 1 }
 0x271   :  { %1281 = vsyncpa [#allocation4 + $0x1], 1 }

</bundles_post_ra>
